<compile_context>
chip_gen: v6e
topology: v6e:2x2x1
jax: 0.10.0
libtpu: 0.0.40
codegen_flags: <defaults>
</compile_context>

<pallas_src>
import functools
import math

import jax
import jax.numpy as jnp
from jax.experimental import pallas as pl
from jax.experimental.pallas import tpu as pltpu


# ----------------------------- fused Pallas kernel -----------------------------

def _encoder_stack_kernel(x_ref,
                          in_w_ref, in_b_ref,      # (L, d, 3d), (L, 1, 3d)  (W^T, scale folded)
                          out_w_ref, out_b_ref,    # (L, d, d),  (L, 1, d)
                          ff1_w_ref, ff1_b_ref,    # (L, d, dff), (L, 1, dff)
                          ff2_w_ref, ff2_b_ref,    # (L, dff, d), (L, 1, d)
                          ln1_g_ref, ln1_b_ref,    # (L, 1, d)
                          ln2_g_ref, ln2_b_ref,    # (L, 1, d)
                          o_ref,
                          *, S, B, H, num_layers, eps):
    f32 = jnp.float32
    x = x_ref[...].astype(f32)                      # (N, d) tokens, batch-major (N = B*S)
    n, d = x.shape
    dh = d // H

    def layer_norm(y, g, b):
        mean = jnp.mean(y, axis=-1, keepdims=True)
        yc = y - mean
        var = jnp.mean(yc * yc, axis=-1, keepdims=True)
        return yc * jax.lax.rsqrt(var + eps) * g + b

    for l in range(num_layers):                     # static unrolled loop over layers
        in_w = in_w_ref[l].astype(f32)
        in_b = in_b_ref[l].astype(f32)
        out_w = out_w_ref[l].astype(f32)
        out_b = out_b_ref[l].astype(f32)

        # --- multi-head self attention (softmax scale pre-folded into Q cols) ---
        qkv = jnp.dot(x, in_w, preferred_element_type=f32) + in_b   # (n, 3d)
        q = qkv[:, :d]
        k = qkv[:, d:2 * d]
        v = qkv[:, 2 * d:]

        attn = jnp.zeros((n, d), f32)
        for h in range(H):                          # static per-head loop, all in VMEM
            c0 = h * dh
            qh = q[:, c0:c0 + dh].reshape(B, S, dh)
            kh = k[:, c0:c0 + dh].reshape(B, S, dh)
            vh = v[:, c0:c0 + dh].reshape(B, S, dh)
            s = jnp.einsum('bqd,bkd->bqk', qh, kh,
                           preferred_element_type=f32)              # (B, S, S)
            m = jnp.max(s, axis=-1, keepdims=True)
            p = jnp.exp(s - m)
            denom = jnp.sum(p, axis=-1, keepdims=True)
            p = p * pl.reciprocal(denom, approx=True)
            ctx = jnp.einsum('bqk,bkd->bqd', p, vh,
                             preferred_element_type=f32)            # (B, S, dh)
            # fold this head's contribution straight into the output projection
            attn = attn + jnp.dot(ctx.reshape(n, dh),
                                  out_w[c0:c0 + dh, :],
                                  preferred_element_type=f32)
        attn = attn + out_b
        # dropout = identity (eval mode)
        x = layer_norm(x + attn,
                       ln1_g_ref[l].astype(f32), ln1_b_ref[l].astype(f32))

        # --- feed forward (relu) ---
        hdn = jnp.dot(x, ff1_w_ref[l].astype(f32),
                      preferred_element_type=f32) + ff1_b_ref[l].astype(f32)
        hdn = jnp.maximum(hdn, 0.0)
        ff = jnp.dot(hdn, ff2_w_ref[l].astype(f32),
                     preferred_element_type=f32) + ff2_b_ref[l].astype(f32)
        x = layer_norm(x + ff,
                       ln2_g_ref[l].astype(f32), ln2_b_ref[l].astype(f32))

    o_ref[...] = x.astype(o_ref.dtype)


# ------------------------------ JAX wrappers ------------------------------

def prepare_params(params, nhead):
    """One-time host-side prep: transpose weights to (d_in, d_out), fold the
    1/sqrt(head_dim) softmax scale into the Q projection, stack over layers."""
    d = params[0]['out_proj_w'].shape[0]
    dh = d // nhead
    scale = 1.0 / math.sqrt(dh)

    def prep_layer(p):
        in_w = p['in_proj_w'].T                      # (d, 3d)
        in_b = p['in_proj_b']                        # (3d,)
        col_scale = jnp.concatenate([jnp.full((d,), scale, in_w.dtype),
                                     jnp.ones((2 * d,), in_w.dtype)])
        in_w = in_w * col_scale[None, :]
        in_b = in_b * col_scale
        return dict(
            in_w=in_w, in_b=in_b.reshape(1, 3 * d),
            out_w=p['out_proj_w'].T, out_b=p['out_proj_b'].reshape(1, d),
            ff1_w=p['ff1_w'].T, ff1_b=p['ff1_b'].reshape(1, -1),
            ff2_w=p['ff2_w'].T, ff2_b=p['ff2_b'].reshape(1, d),
            ln1_g=p['ln1_g'].reshape(1, d), ln1_b=p['ln1_b'].reshape(1, d),
            ln2_g=p['ln2_g'].reshape(1, d), ln2_b=p['ln2_b'].reshape(1, d),
        )

    per_layer = [prep_layer(p) for p in params]
    return {k: jnp.stack([lp[k] for lp in per_layer], axis=0)
            for k in per_layer[0]}


def transformer_frame(frame, prepped, *, nhead, eps=1e-5):
    """frame: (S, B, d_model) — PyTorch layout (batch_first=False)."""
    S, B, d = frame.shape
    num_layers = prepped['in_w'].shape[0]
    # batch-major token slab (B*S, d) so each batch's sequence is contiguous
    x2d = jnp.transpose(frame, (1, 0, 2)).reshape(B * S, d)

    kernel = functools.partial(_encoder_stack_kernel, S=S, B=B, H=nhead,
                               num_layers=num_layers, eps=eps)
    vmem = pl.BlockSpec(memory_space=pltpu.MemorySpace.VMEM)
    out = pl.pallas_call(
        kernel,
        out_shape=jax.ShapeDtypeStruct((B * S, d), frame.dtype),
        in_specs=[vmem] * 13,
        out_specs=vmem,
    )(x2d,
      prepped['in_w'], prepped['in_b'],
      prepped['out_w'], prepped['out_b'],
      prepped['ff1_w'], prepped['ff1_b'],
      prepped['ff2_w'], prepped['ff2_b'],
      prepped['ln1_g'], prepped['ln1_b'],
      prepped['ln2_g'], prepped['ln2_b'])
    return jnp.transpose(out.reshape(B, S, d), (1, 0, 2))


# ------------------------------ reference & init ------------------------------

def init_params(key, num_layers, d_model, nhead, dim_ff, dtype=jnp.float32):
    params = []
    for l in range(num_layers):
        k = jax.random.fold_in(key, l)
        ks = jax.random.split(k, 4)
        scale = 0.02
        params.append(dict(
            in_proj_w=scale * jax.random.normal(ks[0], (3 * d_model, d_model), dtype),
            in_proj_b=jnp.zeros((3 * d_model,), dtype),
            out_proj_w=scale * jax.random.normal(ks[1], (d_model, d_model), dtype),
            out_proj_b=jnp.zeros((d_model,), dtype),
            ff1_w=scale * jax.random.normal(ks[2], (dim_ff, d_model), dtype),
            ff1_b=jnp.zeros((dim_ff,), dtype),
            ff2_w=scale * jax.random.normal(ks[3], (d_model, dim_ff), dtype),
            ff2_b=jnp.zeros((d_model,), dtype),
            ln1_g=jnp.ones((d_model,), dtype),
            ln1_b=jnp.zeros((d_model,), dtype),
            ln2_g=jnp.ones((d_model,), dtype),
            ln2_b=jnp.zeros((d_model,), dtype),
        ))
    return params


def reference_forward(frame, params, nhead, eps=1e-5):
    """Plain-JAX reference matching PyTorch TransformerEncoder (eval, post-norm, relu)."""
    S, B, d = frame.shape
    H = nhead
    dh = d // H
    x = jnp.transpose(frame, (1, 0, 2))              # (B, S, d)

    def ln(y, g, b):
        mu = jnp.mean(y, -1, keepdims=True)
        var = jnp.mean((y - mu) ** 2, -1, keepdims=True)
        return (y - mu) / jnp.sqrt(var + eps) * g + b

    for p in params:
        qkv = jnp.einsum('bsd,ed->bse', x, p['in_proj_w']) + p['in_proj_b']
        q, k, v = jnp.split(qkv, 3, axis=-1)
        q = q.reshape(B, S, H, dh).transpose(0, 2, 1, 3)
        k = k.reshape(B, S, H, dh).transpose(0, 2, 1, 3)
        v = v.reshape(B, S, H, dh).transpose(0, 2, 1, 3)
        s = jnp.einsum('bhqd,bhkd->bhqk', q, k) / math.sqrt(dh)
        a = jax.nn.softmax(s, axis=-1)
        ctx = jnp.einsum('bhqk,bhkd->bhqd', a, v)
        ctx = ctx.transpose(0, 2, 1, 3).reshape(B, S, d)
        attn = jnp.einsum('bsd,ed->bse', ctx, p['out_proj_w']) + p['out_proj_b']
        x = ln(x + attn, p['ln1_g'], p['ln1_b'])
        h1 = jax.nn.relu(jnp.einsum('bsd,fd->bsf', x, p['ff1_w']) + p['ff1_b'])
        ff = jnp.einsum('bsf,df->bsd', h1, p['ff2_w']) + p['ff2_b']
        x = ln(x + ff, p['ln2_g'], p['ln2_b'])
    return jnp.transpose(x, (1, 0, 2))


# ------------------------------------ main ------------------------------------

if __name__ == "__main__":
    # representation_cfg
    d_model, nhead, dim_ff, num_layers, dropout = 32, 4, 64, 2, 0.0
    S, B = 8, 2   # (seq, batch) — batch_first=False layout

    key = jax.random.PRNGKey(0)
    k_in, k_par = jax.random.split(key)
    frame = jax.random.normal(k_in, (S, B, d_model), jnp.float32)
    params = init_params(k_par, num_layers, d_model, nhead, dim_ff)
    prepped = prepare_params(params, nhead)

    fwd = jax.jit(functools.partial(transformer_frame, nhead=nhead))
    out = jax.block_until_ready(fwd(frame, prepped))

    assert out.shape == (S, B, d_model), out.shape
    assert bool(jnp.all(jnp.isfinite(out)))

    ref = jax.block_until_ready(reference_forward(frame, params, nhead))
    assert bool(jnp.allclose(out, ref, atol=5e-2, rtol=5e-2))

    print("KERNEL_OK")
</pallas_src>

<mosaic_0001>
module attributes {stable_mosaic.version = 11 : i64} {
  func.func @_encoder_stack_kernel(%arg0: memref<16x32xf32, #tpu.memory_space<vmem>>, %arg1: memref<2x32x96xf32, #tpu.memory_space<vmem>>, %arg2: memref<2x1x96xf32, #tpu.memory_space<vmem>>, %arg3: memref<2x32x32xf32, #tpu.memory_space<vmem>>, %arg4: memref<2x1x32xf32, #tpu.memory_space<vmem>>, %arg5: memref<2x32x64xf32, #tpu.memory_space<vmem>>, %arg6: memref<2x1x64xf32, #tpu.memory_space<vmem>>, %arg7: memref<2x64x32xf32, #tpu.memory_space<vmem>>, %arg8: memref<2x1x32xf32, #tpu.memory_space<vmem>>, %arg9: memref<2x1x32xf32, #tpu.memory_space<vmem>>, %arg10: memref<2x1x32xf32, #tpu.memory_space<vmem>>, %arg11: memref<2x1x32xf32, #tpu.memory_space<vmem>>, %arg12: memref<2x1x32xf32, #tpu.memory_space<vmem>>, %arg13: memref<16x32xf32, #tpu.memory_space<vmem>>) attributes {dimension_semantics = [], scalar_prefetch = 0 : i64, scratch_operands = 0 : i64, tpu.core_type = #tpu.core_type<tc>} {
    %c0 = arith.constant 0 : index
    %c0_0 = arith.constant 0 : index
    %0 = vector.load %arg0[%c0, %c0_0] : memref<16x32xf32, #tpu.memory_space<vmem>>, vector<16x32xf32>
    %c0_1 = arith.constant 0 : index
    %c0_2 = arith.constant 0 : index
    %c0_3 = arith.constant 0 : index
    %1 = vector.load %arg1[%c0_1, %c0_2, %c0_3] : memref<2x32x96xf32, #tpu.memory_space<vmem>>, vector<1x32x96xf32>
    %2 = vector.shape_cast %1 : vector<1x32x96xf32> to vector<32x96xf32>
    %c0_4 = arith.constant 0 : index
    %c0_5 = arith.constant 0 : index
    %c0_6 = arith.constant 0 : index
    %3 = vector.load %arg2[%c0_4, %c0_5, %c0_6] : memref<2x1x96xf32, #tpu.memory_space<vmem>>, vector<1x1x96xf32>
    %4 = vector.shape_cast %3 : vector<1x1x96xf32> to vector<1x96xf32>
    %c0_7 = arith.constant 0 : index
    %c0_8 = arith.constant 0 : index
    %c0_9 = arith.constant 0 : index
    %5 = vector.load %arg3[%c0_7, %c0_8, %c0_9] : memref<2x32x32xf32, #tpu.memory_space<vmem>>, vector<1x32x32xf32>
    %6 = vector.shape_cast %5 : vector<1x32x32xf32> to vector<32x32xf32>
    %c0_10 = arith.constant 0 : index
    %c0_11 = arith.constant 0 : index
    %c0_12 = arith.constant 0 : index
    %7 = vector.load %arg4[%c0_10, %c0_11, %c0_12] : memref<2x1x32xf32, #tpu.memory_space<vmem>>, vector<1x1x32xf32>
    %8 = vector.shape_cast %7 : vector<1x1x32xf32> to vector<1x32xf32>
    %cst = arith.constant dense<0.000000e+00> : vector<16x96xf32>
    %9 = tpu.matmul %0, %2, %cst {dimension_numbers = #tpu.dot_dimension_numbers<[1], [0], [0], [1], [0, 0, 1, 1], [], []>} : vector<16x32xf32>, vector<32x96xf32>, vector<16x96xf32> -> vector<16x96xf32>
    %10 = vector.broadcast %4 : vector<1x96xf32> to vector<16x96xf32>
    %11 = arith.addf %9, %10 : vector<16x96xf32>
    %12 = vector.extract_strided_slice %11 {offsets = [0, 0], sizes = [16, 32], strides = [1, 1]} : vector<16x96xf32> to vector<16x32xf32>
    %13 = vector.extract_strided_slice %11 {offsets = [0, 32], sizes = [16, 32], strides = [1, 1]} : vector<16x96xf32> to vector<16x32xf32>
    %14 = vector.extract_strided_slice %11 {offsets = [0, 64], sizes = [16, 32], strides = [1, 1]} : vector<16x96xf32> to vector<16x32xf32>
    %cst_13 = arith.constant 0.000000e+00 : f32
    %15 = vector.broadcast %cst_13 : f32 to vector<16x32xf32>
    %16 = vector.extract_strided_slice %12 {offsets = [0, 0], sizes = [16, 8], strides = [1, 1]} : vector<16x32xf32> to vector<16x8xf32>
    %17 = vector.shape_cast %16 : vector<16x8xf32> to vector<2x8x8xf32>
    %18 = vector.extract_strided_slice %13 {offsets = [0, 0], sizes = [16, 8], strides = [1, 1]} : vector<16x32xf32> to vector<16x8xf32>
    %19 = vector.shape_cast %18 : vector<16x8xf32> to vector<2x8x8xf32>
    %20 = vector.extract_strided_slice %14 {offsets = [0, 0], sizes = [16, 8], strides = [1, 1]} : vector<16x32xf32> to vector<16x8xf32>
    %21 = vector.shape_cast %20 : vector<16x8xf32> to vector<2x8x8xf32>
    "tpu.trace_start"() <{level = 10 : i32, message = "bqd,bkd->bqk"}> : () -> ()
    %cst_14 = arith.constant dense<0.000000e+00> : vector<2x8x8xf32>
    %22 = tpu.matmul %17, %19, %cst_14 {dimension_numbers = #tpu.dot_dimension_numbers<[2], [2], [1], [1], [0, 0, 0, 1, 1, 1], [0], [0]>} : vector<2x8x8xf32>, vector<2x8x8xf32>, vector<2x8x8xf32> -> vector<2x8x8xf32>
    "tpu.trace_stop"() : () -> ()
    %cst_15 = arith.constant dense<0xFF800000> : vector<2x8xf32>
    %23 = vector.multi_reduction <maximumf>, %22, %cst_15 [2] : vector<2x8x8xf32> to vector<2x8xf32>
    %24 = vector.shape_cast %23 : vector<2x8xf32> to vector<2x8x1xf32>
    %25 = vector.broadcast %24 : vector<2x8x1xf32> to vector<2x8x8xf32>
    %26 = arith.subf %22, %25 : vector<2x8x8xf32>
    %27 = math.exp %26 : vector<2x8x8xf32>
    %cst_16 = arith.constant dense<0.000000e+00> : vector<2x8xf32>
    %28 = vector.multi_reduction <add>, %27, %cst_16 [2] : vector<2x8x8xf32> to vector<2x8xf32>
    %29 = vector.shape_cast %28 : vector<2x8xf32> to vector<2x8x1xf32>
    %30 = tpu.reciprocal %29 {approx = true} : vector<2x8x1xf32> -> vector<2x8x1xf32>
    %31 = vector.broadcast %30 : vector<2x8x1xf32> to vector<2x8x8xf32>
    %32 = arith.mulf %27, %31 : vector<2x8x8xf32>
    "tpu.trace_start"() <{level = 10 : i32, message = "bqk,bkd->bqd"}> : () -> ()
    %cst_17 = arith.constant dense<0.000000e+00> : vector<2x8x8xf32>
    %33 = tpu.matmul %32, %21, %cst_17 {dimension_numbers = #tpu.dot_dimension_numbers<[2], [1], [1], [2], [0, 0, 0, 1, 1, 2], [0], [0]>} : vector<2x8x8xf32>, vector<2x8x8xf32>, vector<2x8x8xf32> -> vector<2x8x8xf32>
    "tpu.trace_stop"() : () -> ()
    %34 = vector.shape_cast %33 : vector<2x8x8xf32> to vector<16x8xf32>
    %35 = vector.extract_strided_slice %6 {offsets = [0, 0], sizes = [8, 32], strides = [1, 1]} : vector<32x32xf32> to vector<8x32xf32>
    %cst_18 = arith.constant dense<0.000000e+00> : vector<16x32xf32>
    %36 = tpu.matmul %34, %35, %cst_18 {dimension_numbers = #tpu.dot_dimension_numbers<[1], [0], [0], [1], [0, 0, 1, 1], [], []>} : vector<16x8xf32>, vector<8x32xf32>, vector<16x32xf32> -> vector<16x32xf32>
    %37 = arith.addf %15, %36 : vector<16x32xf32>
    %38 = vector.extract_strided_slice %12 {offsets = [0, 8], sizes = [16, 8], strides = [1, 1]} : vector<16x32xf32> to vector<16x8xf32>
    %39 = vector.shape_cast %38 : vector<16x8xf32> to vector<2x8x8xf32>
    %40 = vector.extract_strided_slice %13 {offsets = [0, 8], sizes = [16, 8], strides = [1, 1]} : vector<16x32xf32> to vector<16x8xf32>
    %41 = vector.shape_cast %40 : vector<16x8xf32> to vector<2x8x8xf32>
    %42 = vector.extract_strided_slice %14 {offsets = [0, 8], sizes = [16, 8], strides = [1, 1]} : vector<16x32xf32> to vector<16x8xf32>
    %43 = vector.shape_cast %42 : vector<16x8xf32> to vector<2x8x8xf32>
    "tpu.trace_start"() <{level = 10 : i32, message = "bqd,bkd->bqk"}> : () -> ()
    %cst_19 = arith.constant dense<0.000000e+00> : vector<2x8x8xf32>
    %44 = tpu.matmul %39, %41, %cst_19 {dimension_numbers = #tpu.dot_dimension_numbers<[2], [2], [1], [1], [0, 0, 0, 1, 1, 1], [0], [0]>} : vector<2x8x8xf32>, vector<2x8x8xf32>, vector<2x8x8xf32> -> vector<2x8x8xf32>
    "tpu.trace_stop"() : () -> ()
    %cst_20 = arith.constant dense<0xFF800000> : vector<2x8xf32>
    %45 = vector.multi_reduction <maximumf>, %44, %cst_20 [2] : vector<2x8x8xf32> to vector<2x8xf32>
    %46 = vector.shape_cast %45 : vector<2x8xf32> to vector<2x8x1xf32>
    %47 = vector.broadcast %46 : vector<2x8x1xf32> to vector<2x8x8xf32>
    %48 = arith.subf %44, %47 : vector<2x8x8xf32>
    %49 = math.exp %48 : vector<2x8x8xf32>
    %cst_21 = arith.constant dense<0.000000e+00> : vector<2x8xf32>
    %50 = vector.multi_reduction <add>, %49, %cst_21 [2] : vector<2x8x8xf32> to vector<2x8xf32>
    %51 = vector.shape_cast %50 : vector<2x8xf32> to vector<2x8x1xf32>
    %52 = tpu.reciprocal %51 {approx = true} : vector<2x8x1xf32> -> vector<2x8x1xf32>
    %53 = vector.broadcast %52 : vector<2x8x1xf32> to vector<2x8x8xf32>
    %54 = arith.mulf %49, %53 : vector<2x8x8xf32>
    "tpu.trace_start"() <{level = 10 : i32, message = "bqk,bkd->bqd"}> : () -> ()
    %cst_22 = arith.constant dense<0.000000e+00> : vector<2x8x8xf32>
    %55 = tpu.matmul %54, %43, %cst_22 {dimension_numbers = #tpu.dot_dimension_numbers<[2], [1], [1], [2], [0, 0, 0, 1, 1, 2], [0], [0]>} : vector<2x8x8xf32>, vector<2x8x8xf32>, vector<2x8x8xf32> -> vector<2x8x8xf32>
    "tpu.trace_stop"() : () -> ()
    %56 = vector.shape_cast %55 : vector<2x8x8xf32> to vector<16x8xf32>
    %57 = vector.extract_strided_slice %6 {offsets = [8, 0], sizes = [8, 32], strides = [1, 1]} : vector<32x32xf32> to vector<8x32xf32>
    %cst_23 = arith.constant dense<0.000000e+00> : vector<16x32xf32>
    %58 = tpu.matmul %56, %57, %cst_23 {dimension_numbers = #tpu.dot_dimension_numbers<[1], [0], [0], [1], [0, 0, 1, 1], [], []>} : vector<16x8xf32>, vector<8x32xf32>, vector<16x32xf32> -> vector<16x32xf32>
    %59 = arith.addf %37, %58 : vector<16x32xf32>
    %60 = vector.extract_strided_slice %12 {offsets = [0, 16], sizes = [16, 8], strides = [1, 1]} : vector<16x32xf32> to vector<16x8xf32>
    %61 = vector.shape_cast %60 : vector<16x8xf32> to vector<2x8x8xf32>
    %62 = vector.extract_strided_slice %13 {offsets = [0, 16], sizes = [16, 8], strides = [1, 1]} : vector<16x32xf32> to vector<16x8xf32>
    %63 = vector.shape_cast %62 : vector<16x8xf32> to vector<2x8x8xf32>
    %64 = vector.extract_strided_slice %14 {offsets = [0, 16], sizes = [16, 8], strides = [1, 1]} : vector<16x32xf32> to vector<16x8xf32>
    %65 = vector.shape_cast %64 : vector<16x8xf32> to vector<2x8x8xf32>
    "tpu.trace_start"() <{level = 10 : i32, message = "bqd,bkd->bqk"}> : () -> ()
    %cst_24 = arith.constant dense<0.000000e+00> : vector<2x8x8xf32>
    %66 = tpu.matmul %61, %63, %cst_24 {dimension_numbers = #tpu.dot_dimension_numbers<[2], [2], [1], [1], [0, 0, 0, 1, 1, 1], [0], [0]>} : vector<2x8x8xf32>, vector<2x8x8xf32>, vector<2x8x8xf32> -> vector<2x8x8xf32>
    "tpu.trace_stop"() : () -> ()
    %cst_25 = arith.constant dense<0xFF800000> : vector<2x8xf32>
    %67 = vector.multi_reduction <maximumf>, %66, %cst_25 [2] : vector<2x8x8xf32> to vector<2x8xf32>
    %68 = vector.shape_cast %67 : vector<2x8xf32> to vector<2x8x1xf32>
    %69 = vector.broadcast %68 : vector<2x8x1xf32> to vector<2x8x8xf32>
    %70 = arith.subf %66, %69 : vector<2x8x8xf32>
    %71 = math.exp %70 : vector<2x8x8xf32>
    %cst_26 = arith.constant dense<0.000000e+00> : vector<2x8xf32>
    %72 = vector.multi_reduction <add>, %71, %cst_26 [2] : vector<2x8x8xf32> to vector<2x8xf32>
    %73 = vector.shape_cast %72 : vector<2x8xf32> to vector<2x8x1xf32>
    %74 = tpu.reciprocal %73 {approx = true} : vector<2x8x1xf32> -> vector<2x8x1xf32>
    %75 = vector.broadcast %74 : vector<2x8x1xf32> to vector<2x8x8xf32>
    %76 = arith.mulf %71, %75 : vector<2x8x8xf32>
    "tpu.trace_start"() <{level = 10 : i32, message = "bqk,bkd->bqd"}> : () -> ()
    %cst_27 = arith.constant dense<0.000000e+00> : vector<2x8x8xf32>
    %77 = tpu.matmul %76, %65, %cst_27 {dimension_numbers = #tpu.dot_dimension_numbers<[2], [1], [1], [2], [0, 0, 0, 1, 1, 2], [0], [0]>} : vector<2x8x8xf32>, vector<2x8x8xf32>, vector<2x8x8xf32> -> vector<2x8x8xf32>
    "tpu.trace_stop"() : () -> ()
    %78 = vector.shape_cast %77 : vector<2x8x8xf32> to vector<16x8xf32>
    %79 = vector.extract_strided_slice %6 {offsets = [16, 0], sizes = [8, 32], strides = [1, 1]} : vector<32x32xf32> to vector<8x32xf32>
    %cst_28 = arith.constant dense<0.000000e+00> : vector<16x32xf32>
    %80 = tpu.matmul %78, %79, %cst_28 {dimension_numbers = #tpu.dot_dimension_numbers<[1], [0], [0], [1], [0, 0, 1, 1], [], []>} : vector<16x8xf32>, vector<8x32xf32>, vector<16x32xf32> -> vector<16x32xf32>
    %81 = arith.addf %59, %80 : vector<16x32xf32>
    %82 = vector.extract_strided_slice %12 {offsets = [0, 24], sizes = [16, 8], strides = [1, 1]} : vector<16x32xf32> to vector<16x8xf32>
    %83 = vector.shape_cast %82 : vector<16x8xf32> to vector<2x8x8xf32>
    %84 = vector.extract_strided_slice %13 {offsets = [0, 24], sizes = [16, 8], strides = [1, 1]} : vector<16x32xf32> to vector<16x8xf32>
    %85 = vector.shape_cast %84 : vector<16x8xf32> to vector<2x8x8xf32>
    %86 = vector.extract_strided_slice %14 {offsets = [0, 24], sizes = [16, 8], strides = [1, 1]} : vector<16x32xf32> to vector<16x8xf32>
    %87 = vector.shape_cast %86 : vector<16x8xf32> to vector<2x8x8xf32>
    "tpu.trace_start"() <{level = 10 : i32, message = "bqd,bkd->bqk"}> : () -> ()
    %cst_29 = arith.constant dense<0.000000e+00> : vector<2x8x8xf32>
    %88 = tpu.matmul %83, %85, %cst_29 {dimension_numbers = #tpu.dot_dimension_numbers<[2], [2], [1], [1], [0, 0, 0, 1, 1, 1], [0], [0]>} : vector<2x8x8xf32>, vector<2x8x8xf32>, vector<2x8x8xf32> -> vector<2x8x8xf32>
    "tpu.trace_stop"() : () -> ()
    %cst_30 = arith.constant dense<0xFF800000> : vector<2x8xf32>
    %89 = vector.multi_reduction <maximumf>, %88, %cst_30 [2] : vector<2x8x8xf32> to vector<2x8xf32>
    %90 = vector.shape_cast %89 : vector<2x8xf32> to vector<2x8x1xf32>
    %91 = vector.broadcast %90 : vector<2x8x1xf32> to vector<2x8x8xf32>
    %92 = arith.subf %88, %91 : vector<2x8x8xf32>
    %93 = math.exp %92 : vector<2x8x8xf32>
    %cst_31 = arith.constant dense<0.000000e+00> : vector<2x8xf32>
    %94 = vector.multi_reduction <add>, %93, %cst_31 [2] : vector<2x8x8xf32> to vector<2x8xf32>
    %95 = vector.shape_cast %94 : vector<2x8xf32> to vector<2x8x1xf32>
    %96 = tpu.reciprocal %95 {approx = true} : vector<2x8x1xf32> -> vector<2x8x1xf32>
    %97 = vector.broadcast %96 : vector<2x8x1xf32> to vector<2x8x8xf32>
    %98 = arith.mulf %93, %97 : vector<2x8x8xf32>
    "tpu.trace_start"() <{level = 10 : i32, message = "bqk,bkd->bqd"}> : () -> ()
    %cst_32 = arith.constant dense<0.000000e+00> : vector<2x8x8xf32>
    %99 = tpu.matmul %98, %87, %cst_32 {dimension_numbers = #tpu.dot_dimension_numbers<[2], [1], [1], [2], [0, 0, 0, 1, 1, 2], [0], [0]>} : vector<2x8x8xf32>, vector<2x8x8xf32>, vector<2x8x8xf32> -> vector<2x8x8xf32>
    "tpu.trace_stop"() : () -> ()
    %100 = vector.shape_cast %99 : vector<2x8x8xf32> to vector<16x8xf32>
    %101 = vector.extract_strided_slice %6 {offsets = [24, 0], sizes = [8, 32], strides = [1, 1]} : vector<32x32xf32> to vector<8x32xf32>
    %cst_33 = arith.constant dense<0.000000e+00> : vector<16x32xf32>
    %102 = tpu.matmul %100, %101, %cst_33 {dimension_numbers = #tpu.dot_dimension_numbers<[1], [0], [0], [1], [0, 0, 1, 1], [], []>} : vector<16x8xf32>, vector<8x32xf32>, vector<16x32xf32> -> vector<16x32xf32>
    %103 = arith.addf %81, %102 : vector<16x32xf32>
    %104 = vector.broadcast %8 : vector<1x32xf32> to vector<16x32xf32>
    %105 = arith.addf %103, %104 : vector<16x32xf32>
    %106 = arith.addf %0, %105 : vector<16x32xf32>
    %c0_34 = arith.constant 0 : index
    %c0_35 = arith.constant 0 : index
    %c0_36 = arith.constant 0 : index
    %107 = vector.load %arg9[%c0_34, %c0_35, %c0_36] : memref<2x1x32xf32, #tpu.memory_space<vmem>>, vector<1x1x32xf32>
    %108 = vector.shape_cast %107 : vector<1x1x32xf32> to vector<1x32xf32>
    %c0_37 = arith.constant 0 : index
    %c0_38 = arith.constant 0 : index
    %c0_39 = arith.constant 0 : index
    %109 = vector.load %arg10[%c0_37, %c0_38, %c0_39] : memref<2x1x32xf32, #tpu.memory_space<vmem>>, vector<1x1x32xf32>
    %110 = vector.shape_cast %109 : vector<1x1x32xf32> to vector<1x32xf32>
    %cst_40 = arith.constant dense<0.000000e+00> : vector<16xf32>
    %111 = vector.multi_reduction <add>, %106, %cst_40 [1] : vector<16x32xf32> to vector<16xf32>
    %112 = vector.shape_cast %111 : vector<16xf32> to vector<16x1xf32>
    %cst_41 = arith.constant 3.200000e+01 : f32
    %113 = vector.broadcast %cst_41 : f32 to vector<16x1xf32>
    %114 = arith.divf %112, %113 : vector<16x1xf32>
    %115 = vector.broadcast %114 : vector<16x1xf32> to vector<16x32xf32>
    %116 = arith.subf %106, %115 : vector<16x32xf32>
    %117 = arith.mulf %116, %116 : vector<16x32xf32>
    %cst_42 = arith.constant dense<0.000000e+00> : vector<16xf32>
    %118 = vector.multi_reduction <add>, %117, %cst_42 [1] : vector<16x32xf32> to vector<16xf32>
    %119 = vector.shape_cast %118 : vector<16xf32> to vector<16x1xf32>
    %cst_43 = arith.constant 3.200000e+01 : f32
    %120 = vector.broadcast %cst_43 : f32 to vector<16x1xf32>
    %121 = arith.divf %119, %120 : vector<16x1xf32>
    %cst_44 = arith.constant 9.99999974E-6 : f32
    %122 = vector.broadcast %cst_44 : f32 to vector<16x1xf32>
    %123 = arith.addf %121, %122 : vector<16x1xf32>
    %124 = math.rsqrt %123 : vector<16x1xf32>
    %125 = vector.broadcast %124 : vector<16x1xf32> to vector<16x32xf32>
    %126 = arith.mulf %116, %125 : vector<16x32xf32>
    %127 = vector.broadcast %108 : vector<1x32xf32> to vector<16x32xf32>
    %128 = arith.mulf %126, %127 : vector<16x32xf32>
    %129 = vector.broadcast %110 : vector<1x32xf32> to vector<16x32xf32>
    %130 = arith.addf %128, %129 : vector<16x32xf32>
    %c0_45 = arith.constant 0 : index
    %c0_46 = arith.constant 0 : index
    %c0_47 = arith.constant 0 : index
    %131 = vector.load %arg5[%c0_45, %c0_46, %c0_47] : memref<2x32x64xf32, #tpu.memory_space<vmem>>, vector<1x32x64xf32>
    %132 = vector.shape_cast %131 : vector<1x32x64xf32> to vector<32x64xf32>
    %cst_48 = arith.constant dense<0.000000e+00> : vector<16x64xf32>
    %133 = tpu.matmul %130, %132, %cst_48 {dimension_numbers = #tpu.dot_dimension_numbers<[1], [0], [0], [1], [0, 0, 1, 1], [], []>} : vector<16x32xf32>, vector<32x64xf32>, vector<16x64xf32> -> vector<16x64xf32>
    %c0_49 = arith.constant 0 : index
    %c0_50 = arith.constant 0 : index
    %c0_51 = arith.constant 0 : index
    %134 = vector.load %arg6[%c0_49, %c0_50, %c0_51] : memref<2x1x64xf32, #tpu.memory_space<vmem>>, vector<1x1x64xf32>
    %135 = vector.shape_cast %134 : vector<1x1x64xf32> to vector<1x64xf32>
    %136 = vector.broadcast %135 : vector<1x64xf32> to vector<16x64xf32>
    %137 = arith.addf %133, %136 : vector<16x64xf32>
    %cst_52 = arith.constant 0.000000e+00 : f32
    %138 = vector.broadcast %cst_52 : f32 to vector<16x64xf32>
    %139 = arith.maximumf %137, %138 : vector<16x64xf32>
    %c0_53 = arith.constant 0 : index
    %c0_54 = arith.constant 0 : index
    %c0_55 = arith.constant 0 : index
    %140 = vector.load %arg7[%c0_53, %c0_54, %c0_55] : memref<2x64x32xf32, #tpu.memory_space<vmem>>, vector<1x64x32xf32>
    %141 = vector.shape_cast %140 : vector<1x64x32xf32> to vector<64x32xf32>
    %cst_56 = arith.constant dense<0.000000e+00> : vector<16x32xf32>
    %142 = tpu.matmul %139, %141, %cst_56 {dimension_numbers = #tpu.dot_dimension_numbers<[1], [0], [0], [1], [0, 0, 1, 1], [], []>} : vector<16x64xf32>, vector<64x32xf32>, vector<16x32xf32> -> vector<16x32xf32>
    %c0_57 = arith.constant 0 : index
    %c0_58 = arith.constant 0 : index
    %c0_59 = arith.constant 0 : index
    %143 = vector.load %arg8[%c0_57, %c0_58, %c0_59] : memref<2x1x32xf32, #tpu.memory_space<vmem>>, vector<1x1x32xf32>
    %144 = vector.shape_cast %143 : vector<1x1x32xf32> to vector<1x32xf32>
    %145 = vector.broadcast %144 : vector<1x32xf32> to vector<16x32xf32>
    %146 = arith.addf %142, %145 : vector<16x32xf32>
    %147 = arith.addf %130, %146 : vector<16x32xf32>
    %c0_60 = arith.constant 0 : index
    %c0_61 = arith.constant 0 : index
    %c0_62 = arith.constant 0 : index
    %148 = vector.load %arg11[%c0_60, %c0_61, %c0_62] : memref<2x1x32xf32, #tpu.memory_space<vmem>>, vector<1x1x32xf32>
    %149 = vector.shape_cast %148 : vector<1x1x32xf32> to vector<1x32xf32>
    %c0_63 = arith.constant 0 : index
    %c0_64 = arith.constant 0 : index
    %c0_65 = arith.constant 0 : index
    %150 = vector.load %arg12[%c0_63, %c0_64, %c0_65] : memref<2x1x32xf32, #tpu.memory_space<vmem>>, vector<1x1x32xf32>
    %151 = vector.shape_cast %150 : vector<1x1x32xf32> to vector<1x32xf32>
    %cst_66 = arith.constant dense<0.000000e+00> : vector<16xf32>
    %152 = vector.multi_reduction <add>, %147, %cst_66 [1] : vector<16x32xf32> to vector<16xf32>
    %153 = vector.shape_cast %152 : vector<16xf32> to vector<16x1xf32>
    %cst_67 = arith.constant 3.200000e+01 : f32
    %154 = vector.broadcast %cst_67 : f32 to vector<16x1xf32>
    %155 = arith.divf %153, %154 : vector<16x1xf32>
    %156 = vector.broadcast %155 : vector<16x1xf32> to vector<16x32xf32>
    %157 = arith.subf %147, %156 : vector<16x32xf32>
    %158 = arith.mulf %157, %157 : vector<16x32xf32>
    %cst_68 = arith.constant dense<0.000000e+00> : vector<16xf32>
    %159 = vector.multi_reduction <add>, %158, %cst_68 [1] : vector<16x32xf32> to vector<16xf32>
    %160 = vector.shape_cast %159 : vector<16xf32> to vector<16x1xf32>
    %cst_69 = arith.constant 3.200000e+01 : f32
    %161 = vector.broadcast %cst_69 : f32 to vector<16x1xf32>
    %162 = arith.divf %160, %161 : vector<16x1xf32>
    %cst_70 = arith.constant 9.99999974E-6 : f32
    %163 = vector.broadcast %cst_70 : f32 to vector<16x1xf32>
    %164 = arith.addf %162, %163 : vector<16x1xf32>
    %165 = math.rsqrt %164 : vector<16x1xf32>
    %166 = vector.broadcast %165 : vector<16x1xf32> to vector<16x32xf32>
    %167 = arith.mulf %157, %166 : vector<16x32xf32>
    %168 = vector.broadcast %149 : vector<1x32xf32> to vector<16x32xf32>
    %169 = arith.mulf %167, %168 : vector<16x32xf32>
    %170 = vector.broadcast %151 : vector<1x32xf32> to vector<16x32xf32>
    %171 = arith.addf %169, %170 : vector<16x32xf32>
    %c1 = arith.constant 1 : index
    %c0_71 = arith.constant 0 : index
    %c0_72 = arith.constant 0 : index
    %172 = vector.load %arg1[%c1, %c0_71, %c0_72] : memref<2x32x96xf32, #tpu.memory_space<vmem>>, vector<1x32x96xf32>
    %173 = vector.shape_cast %172 : vector<1x32x96xf32> to vector<32x96xf32>
    %c1_73 = arith.constant 1 : index
    %c0_74 = arith.constant 0 : index
    %c0_75 = arith.constant 0 : index
    %174 = vector.load %arg2[%c1_73, %c0_74, %c0_75] : memref<2x1x96xf32, #tpu.memory_space<vmem>>, vector<1x1x96xf32>
    %175 = vector.shape_cast %174 : vector<1x1x96xf32> to vector<1x96xf32>
    %c1_76 = arith.constant 1 : index
    %c0_77 = arith.constant 0 : index
    %c0_78 = arith.constant 0 : index
    %176 = vector.load %arg3[%c1_76, %c0_77, %c0_78] : memref<2x32x32xf32, #tpu.memory_space<vmem>>, vector<1x32x32xf32>
    %177 = vector.shape_cast %176 : vector<1x32x32xf32> to vector<32x32xf32>
    %c1_79 = arith.constant 1 : index
    %c0_80 = arith.constant 0 : index
    %c0_81 = arith.constant 0 : index
    %178 = vector.load %arg4[%c1_79, %c0_80, %c0_81] : memref<2x1x32xf32, #tpu.memory_space<vmem>>, vector<1x1x32xf32>
    %179 = vector.shape_cast %178 : vector<1x1x32xf32> to vector<1x32xf32>
    %cst_82 = arith.constant dense<0.000000e+00> : vector<16x96xf32>
    %180 = tpu.matmul %171, %173, %cst_82 {dimension_numbers = #tpu.dot_dimension_numbers<[1], [0], [0], [1], [0, 0, 1, 1], [], []>} : vector<16x32xf32>, vector<32x96xf32>, vector<16x96xf32> -> vector<16x96xf32>
    %181 = vector.broadcast %175 : vector<1x96xf32> to vector<16x96xf32>
    %182 = arith.addf %180, %181 : vector<16x96xf32>
    %183 = vector.extract_strided_slice %182 {offsets = [0, 0], sizes = [16, 32], strides = [1, 1]} : vector<16x96xf32> to vector<16x32xf32>
    %184 = vector.extract_strided_slice %182 {offsets = [0, 32], sizes = [16, 32], strides = [1, 1]} : vector<16x96xf32> to vector<16x32xf32>
    %185 = vector.extract_strided_slice %182 {offsets = [0, 64], sizes = [16, 32], strides = [1, 1]} : vector<16x96xf32> to vector<16x32xf32>
    %cst_83 = arith.constant 0.000000e+00 : f32
    %186 = vector.broadcast %cst_83 : f32 to vector<16x32xf32>
    %187 = vector.extract_strided_slice %183 {offsets = [0, 0], sizes = [16, 8], strides = [1, 1]} : vector<16x32xf32> to vector<16x8xf32>
    %188 = vector.shape_cast %187 : vector<16x8xf32> to vector<2x8x8xf32>
    %189 = vector.extract_strided_slice %184 {offsets = [0, 0], sizes = [16, 8], strides = [1, 1]} : vector<16x32xf32> to vector<16x8xf32>
    %190 = vector.shape_cast %189 : vector<16x8xf32> to vector<2x8x8xf32>
    %191 = vector.extract_strided_slice %185 {offsets = [0, 0], sizes = [16, 8], strides = [1, 1]} : vector<16x32xf32> to vector<16x8xf32>
    %192 = vector.shape_cast %191 : vector<16x8xf32> to vector<2x8x8xf32>
    "tpu.trace_start"() <{level = 10 : i32, message = "bqd,bkd->bqk"}> : () -> ()
    %cst_84 = arith.constant dense<0.000000e+00> : vector<2x8x8xf32>
    %193 = tpu.matmul %188, %190, %cst_84 {dimension_numbers = #tpu.dot_dimension_numbers<[2], [2], [1], [1], [0, 0, 0, 1, 1, 1], [0], [0]>} : vector<2x8x8xf32>, vector<2x8x8xf32>, vector<2x8x8xf32> -> vector<2x8x8xf32>
    "tpu.trace_stop"() : () -> ()
    %cst_85 = arith.constant dense<0xFF800000> : vector<2x8xf32>
    %194 = vector.multi_reduction <maximumf>, %193, %cst_85 [2] : vector<2x8x8xf32> to vector<2x8xf32>
    %195 = vector.shape_cast %194 : vector<2x8xf32> to vector<2x8x1xf32>
    %196 = vector.broadcast %195 : vector<2x8x1xf32> to vector<2x8x8xf32>
    %197 = arith.subf %193, %196 : vector<2x8x8xf32>
    %198 = math.exp %197 : vector<2x8x8xf32>
    %cst_86 = arith.constant dense<0.000000e+00> : vector<2x8xf32>
    %199 = vector.multi_reduction <add>, %198, %cst_86 [2] : vector<2x8x8xf32> to vector<2x8xf32>
    %200 = vector.shape_cast %199 : vector<2x8xf32> to vector<2x8x1xf32>
    %201 = tpu.reciprocal %200 {approx = true} : vector<2x8x1xf32> -> vector<2x8x1xf32>
    %202 = vector.broadcast %201 : vector<2x8x1xf32> to vector<2x8x8xf32>
    %203 = arith.mulf %198, %202 : vector<2x8x8xf32>
    "tpu.trace_start"() <{level = 10 : i32, message = "bqk,bkd->bqd"}> : () -> ()
    %cst_87 = arith.constant dense<0.000000e+00> : vector<2x8x8xf32>
    %204 = tpu.matmul %203, %192, %cst_87 {dimension_numbers = #tpu.dot_dimension_numbers<[2], [1], [1], [2], [0, 0, 0, 1, 1, 2], [0], [0]>} : vector<2x8x8xf32>, vector<2x8x8xf32>, vector<2x8x8xf32> -> vector<2x8x8xf32>
    "tpu.trace_stop"() : () -> ()
    %205 = vector.shape_cast %204 : vector<2x8x8xf32> to vector<16x8xf32>
    %206 = vector.extract_strided_slice %177 {offsets = [0, 0], sizes = [8, 32], strides = [1, 1]} : vector<32x32xf32> to vector<8x32xf32>
    %cst_88 = arith.constant dense<0.000000e+00> : vector<16x32xf32>
    %207 = tpu.matmul %205, %206, %cst_88 {dimension_numbers = #tpu.dot_dimension_numbers<[1], [0], [0], [1], [0, 0, 1, 1], [], []>} : vector<16x8xf32>, vector<8x32xf32>, vector<16x32xf32> -> vector<16x32xf32>
    %208 = arith.addf %186, %207 : vector<16x32xf32>
    %209 = vector.extract_strided_slice %183 {offsets = [0, 8], sizes = [16, 8], strides = [1, 1]} : vector<16x32xf32> to vector<16x8xf32>
    %210 = vector.shape_cast %209 : vector<16x8xf32> to vector<2x8x8xf32>
    %211 = vector.extract_strided_slice %184 {offsets = [0, 8], sizes = [16, 8], strides = [1, 1]} : vector<16x32xf32> to vector<16x8xf32>
    %212 = vector.shape_cast %211 : vector<16x8xf32> to vector<2x8x8xf32>
    %213 = vector.extract_strided_slice %185 {offsets = [0, 8], sizes = [16, 8], strides = [1, 1]} : vector<16x32xf32> to vector<16x8xf32>
    %214 = vector.shape_cast %213 : vector<16x8xf32> to vector<2x8x8xf32>
    "tpu.trace_start"() <{level = 10 : i32, message = "bqd,bkd->bqk"}> : () -> ()
    %cst_89 = arith.constant dense<0.000000e+00> : vector<2x8x8xf32>
    %215 = tpu.matmul %210, %212, %cst_89 {dimension_numbers = #tpu.dot_dimension_numbers<[2], [2], [1], [1], [0, 0, 0, 1, 1, 1], [0], [0]>} : vector<2x8x8xf32>, vector<2x8x8xf32>, vector<2x8x8xf32> -> vector<2x8x8xf32>
    "tpu.trace_stop"() : () -> ()
    %cst_90 = arith.constant dense<0xFF800000> : vector<2x8xf32>
    %216 = vector.multi_reduction <maximumf>, %215, %cst_90 [2] : vector<2x8x8xf32> to vector<2x8xf32>
    %217 = vector.shape_cast %216 : vector<2x8xf32> to vector<2x8x1xf32>
    %218 = vector.broadcast %217 : vector<2x8x1xf32> to vector<2x8x8xf32>
    %219 = arith.subf %215, %218 : vector<2x8x8xf32>
    %220 = math.exp %219 : vector<2x8x8xf32>
    %cst_91 = arith.constant dense<0.000000e+00> : vector<2x8xf32>
    %221 = vector.multi_reduction <add>, %220, %cst_91 [2] : vector<2x8x8xf32> to vector<2x8xf32>
    %222 = vector.shape_cast %221 : vector<2x8xf32> to vector<2x8x1xf32>
    %223 = tpu.reciprocal %222 {approx = true} : vector<2x8x1xf32> -> vector<2x8x1xf32>
    %224 = vector.broadcast %223 : vector<2x8x1xf32> to vector<2x8x8xf32>
    %225 = arith.mulf %220, %224 : vector<2x8x8xf32>
    "tpu.trace_start"() <{level = 10 : i32, message = "bqk,bkd->bqd"}> : () -> ()
    %cst_92 = arith.constant dense<0.000000e+00> : vector<2x8x8xf32>
    %226 = tpu.matmul %225, %214, %cst_92 {dimension_numbers = #tpu.dot_dimension_numbers<[2], [1], [1], [2], [0, 0, 0, 1, 1, 2], [0], [0]>} : vector<2x8x8xf32>, vector<2x8x8xf32>, vector<2x8x8xf32> -> vector<2x8x8xf32>
    "tpu.trace_stop"() : () -> ()
    %227 = vector.shape_cast %226 : vector<2x8x8xf32> to vector<16x8xf32>
    %228 = vector.extract_strided_slice %177 {offsets = [8, 0], sizes = [8, 32], strides = [1, 1]} : vector<32x32xf32> to vector<8x32xf32>
    %cst_93 = arith.constant dense<0.000000e+00> : vector<16x32xf32>
    %229 = tpu.matmul %227, %228, %cst_93 {dimension_numbers = #tpu.dot_dimension_numbers<[1], [0], [0], [1], [0, 0, 1, 1], [], []>} : vector<16x8xf32>, vector<8x32xf32>, vector<16x32xf32> -> vector<16x32xf32>
    %230 = arith.addf %208, %229 : vector<16x32xf32>
    %231 = vector.extract_strided_slice %183 {offsets = [0, 16], sizes = [16, 8], strides = [1, 1]} : vector<16x32xf32> to vector<16x8xf32>
    %232 = vector.shape_cast %231 : vector<16x8xf32> to vector<2x8x8xf32>
    %233 = vector.extract_strided_slice %184 {offsets = [0, 16], sizes = [16, 8], strides = [1, 1]} : vector<16x32xf32> to vector<16x8xf32>
    %234 = vector.shape_cast %233 : vector<16x8xf32> to vector<2x8x8xf32>
    %235 = vector.extract_strided_slice %185 {offsets = [0, 16], sizes = [16, 8], strides = [1, 1]} : vector<16x32xf32> to vector<16x8xf32>
    %236 = vector.shape_cast %235 : vector<16x8xf32> to vector<2x8x8xf32>
    "tpu.trace_start"() <{level = 10 : i32, message = "bqd,bkd->bqk"}> : () -> ()
    %cst_94 = arith.constant dense<0.000000e+00> : vector<2x8x8xf32>
    %237 = tpu.matmul %232, %234, %cst_94 {dimension_numbers = #tpu.dot_dimension_numbers<[2], [2], [1], [1], [0, 0, 0, 1, 1, 1], [0], [0]>} : vector<2x8x8xf32>, vector<2x8x8xf32>, vector<2x8x8xf32> -> vector<2x8x8xf32>
    "tpu.trace_stop"() : () -> ()
    %cst_95 = arith.constant dense<0xFF800000> : vector<2x8xf32>
    %238 = vector.multi_reduction <maximumf>, %237, %cst_95 [2] : vector<2x8x8xf32> to vector<2x8xf32>
    %239 = vector.shape_cast %238 : vector<2x8xf32> to vector<2x8x1xf32>
    %240 = vector.broadcast %239 : vector<2x8x1xf32> to vector<2x8x8xf32>
    %241 = arith.subf %237, %240 : vector<2x8x8xf32>
    %242 = math.exp %241 : vector<2x8x8xf32>
    %cst_96 = arith.constant dense<0.000000e+00> : vector<2x8xf32>
    %243 = vector.multi_reduction <add>, %242, %cst_96 [2] : vector<2x8x8xf32> to vector<2x8xf32>
    %244 = vector.shape_cast %243 : vector<2x8xf32> to vector<2x8x1xf32>
    %245 = tpu.reciprocal %244 {approx = true} : vector<2x8x1xf32> -> vector<2x8x1xf32>
    %246 = vector.broadcast %245 : vector<2x8x1xf32> to vector<2x8x8xf32>
    %247 = arith.mulf %242, %246 : vector<2x8x8xf32>
    "tpu.trace_start"() <{level = 10 : i32, message = "bqk,bkd->bqd"}> : () -> ()
    %cst_97 = arith.constant dense<0.000000e+00> : vector<2x8x8xf32>
    %248 = tpu.matmul %247, %236, %cst_97 {dimension_numbers = #tpu.dot_dimension_numbers<[2], [1], [1], [2], [0, 0, 0, 1, 1, 2], [0], [0]>} : vector<2x8x8xf32>, vector<2x8x8xf32>, vector<2x8x8xf32> -> vector<2x8x8xf32>
    "tpu.trace_stop"() : () -> ()
    %249 = vector.shape_cast %248 : vector<2x8x8xf32> to vector<16x8xf32>
    %250 = vector.extract_strided_slice %177 {offsets = [16, 0], sizes = [8, 32], strides = [1, 1]} : vector<32x32xf32> to vector<8x32xf32>
    %cst_98 = arith.constant dense<0.000000e+00> : vector<16x32xf32>
    %251 = tpu.matmul %249, %250, %cst_98 {dimension_numbers = #tpu.dot_dimension_numbers<[1], [0], [0], [1], [0, 0, 1, 1], [], []>} : vector<16x8xf32>, vector<8x32xf32>, vector<16x32xf32> -> vector<16x32xf32>
    %252 = arith.addf %230, %251 : vector<16x32xf32>
    %253 = vector.extract_strided_slice %183 {offsets = [0, 24], sizes = [16, 8], strides = [1, 1]} : vector<16x32xf32> to vector<16x8xf32>
    %254 = vector.shape_cast %253 : vector<16x8xf32> to vector<2x8x8xf32>
    %255 = vector.extract_strided_slice %184 {offsets = [0, 24], sizes = [16, 8], strides = [1, 1]} : vector<16x32xf32> to vector<16x8xf32>
    %256 = vector.shape_cast %255 : vector<16x8xf32> to vector<2x8x8xf32>
    %257 = vector.extract_strided_slice %185 {offsets = [0, 24], sizes = [16, 8], strides = [1, 1]} : vector<16x32xf32> to vector<16x8xf32>
    %258 = vector.shape_cast %257 : vector<16x8xf32> to vector<2x8x8xf32>
    "tpu.trace_start"() <{level = 10 : i32, message = "bqd,bkd->bqk"}> : () -> ()
    %cst_99 = arith.constant dense<0.000000e+00> : vector<2x8x8xf32>
    %259 = tpu.matmul %254, %256, %cst_99 {dimension_numbers = #tpu.dot_dimension_numbers<[2], [2], [1], [1], [0, 0, 0, 1, 1, 1], [0], [0]>} : vector<2x8x8xf32>, vector<2x8x8xf32>, vector<2x8x8xf32> -> vector<2x8x8xf32>
    "tpu.trace_stop"() : () -> ()
    %cst_100 = arith.constant dense<0xFF800000> : vector<2x8xf32>
    %260 = vector.multi_reduction <maximumf>, %259, %cst_100 [2] : vector<2x8x8xf32> to vector<2x8xf32>
    %261 = vector.shape_cast %260 : vector<2x8xf32> to vector<2x8x1xf32>
    %262 = vector.broadcast %261 : vector<2x8x1xf32> to vector<2x8x8xf32>
    %263 = arith.subf %259, %262 : vector<2x8x8xf32>
    %264 = math.exp %263 : vector<2x8x8xf32>
    %cst_101 = arith.constant dense<0.000000e+00> : vector<2x8xf32>
    %265 = vector.multi_reduction <add>, %264, %cst_101 [2] : vector<2x8x8xf32> to vector<2x8xf32>
    %266 = vector.shape_cast %265 : vector<2x8xf32> to vector<2x8x1xf32>
    %267 = tpu.reciprocal %266 {approx = true} : vector<2x8x1xf32> -> vector<2x8x1xf32>
    %268 = vector.broadcast %267 : vector<2x8x1xf32> to vector<2x8x8xf32>
    %269 = arith.mulf %264, %268 : vector<2x8x8xf32>
    "tpu.trace_start"() <{level = 10 : i32, message = "bqk,bkd->bqd"}> : () -> ()
    %cst_102 = arith.constant dense<0.000000e+00> : vector<2x8x8xf32>
    %270 = tpu.matmul %269, %258, %cst_102 {dimension_numbers = #tpu.dot_dimension_numbers<[2], [1], [1], [2], [0, 0, 0, 1, 1, 2], [0], [0]>} : vector<2x8x8xf32>, vector<2x8x8xf32>, vector<2x8x8xf32> -> vector<2x8x8xf32>
    "tpu.trace_stop"() : () -> ()
    %271 = vector.shape_cast %270 : vector<2x8x8xf32> to vector<16x8xf32>
    %272 = vector.extract_strided_slice %177 {offsets = [24, 0], sizes = [8, 32], strides = [1, 1]} : vector<32x32xf32> to vector<8x32xf32>
    %cst_103 = arith.constant dense<0.000000e+00> : vector<16x32xf32>
    %273 = tpu.matmul %271, %272, %cst_103 {dimension_numbers = #tpu.dot_dimension_numbers<[1], [0], [0], [1], [0, 0, 1, 1], [], []>} : vector<16x8xf32>, vector<8x32xf32>, vector<16x32xf32> -> vector<16x32xf32>
    %274 = arith.addf %252, %273 : vector<16x32xf32>
    %275 = vector.broadcast %179 : vector<1x32xf32> to vector<16x32xf32>
    %276 = arith.addf %274, %275 : vector<16x32xf32>
    %277 = arith.addf %171, %276 : vector<16x32xf32>
    %c1_104 = arith.constant 1 : index
    %c0_105 = arith.constant 0 : index
    %c0_106 = arith.constant 0 : index
    %278 = vector.load %arg9[%c1_104, %c0_105, %c0_106] : memref<2x1x32xf32, #tpu.memory_space<vmem>>, vector<1x1x32xf32>
    %279 = vector.shape_cast %278 : vector<1x1x32xf32> to vector<1x32xf32>
    %c1_107 = arith.constant 1 : index
    %c0_108 = arith.constant 0 : index
    %c0_109 = arith.constant 0 : index
    %280 = vector.load %arg10[%c1_107, %c0_108, %c0_109] : memref<2x1x32xf32, #tpu.memory_space<vmem>>, vector<1x1x32xf32>
    %281 = vector.shape_cast %280 : vector<1x1x32xf32> to vector<1x32xf32>
    %cst_110 = arith.constant dense<0.000000e+00> : vector<16xf32>
    %282 = vector.multi_reduction <add>, %277, %cst_110 [1] : vector<16x32xf32> to vector<16xf32>
    %283 = vector.shape_cast %282 : vector<16xf32> to vector<16x1xf32>
    %cst_111 = arith.constant 3.200000e+01 : f32
    %284 = vector.broadcast %cst_111 : f32 to vector<16x1xf32>
    %285 = arith.divf %283, %284 : vector<16x1xf32>
    %286 = vector.broadcast %285 : vector<16x1xf32> to vector<16x32xf32>
    %287 = arith.subf %277, %286 : vector<16x32xf32>
    %288 = arith.mulf %287, %287 : vector<16x32xf32>
    %cst_112 = arith.constant dense<0.000000e+00> : vector<16xf32>
    %289 = vector.multi_reduction <add>, %288, %cst_112 [1] : vector<16x32xf32> to vector<16xf32>
    %290 = vector.shape_cast %289 : vector<16xf32> to vector<16x1xf32>
    %cst_113 = arith.constant 3.200000e+01 : f32
    %291 = vector.broadcast %cst_113 : f32 to vector<16x1xf32>
    %292 = arith.divf %290, %291 : vector<16x1xf32>
    %cst_114 = arith.constant 9.99999974E-6 : f32
    %293 = vector.broadcast %cst_114 : f32 to vector<16x1xf32>
    %294 = arith.addf %292, %293 : vector<16x1xf32>
    %295 = math.rsqrt %294 : vector<16x1xf32>
    %296 = vector.broadcast %295 : vector<16x1xf32> to vector<16x32xf32>
    %297 = arith.mulf %287, %296 : vector<16x32xf32>
    %298 = vector.broadcast %279 : vector<1x32xf32> to vector<16x32xf32>
    %299 = arith.mulf %297, %298 : vector<16x32xf32>
    %300 = vector.broadcast %281 : vector<1x32xf32> to vector<16x32xf32>
    %301 = arith.addf %299, %300 : vector<16x32xf32>
    %c1_115 = arith.constant 1 : index
    %c0_116 = arith.constant 0 : index
    %c0_117 = arith.constant 0 : index
    %302 = vector.load %arg5[%c1_115, %c0_116, %c0_117] : memref<2x32x64xf32, #tpu.memory_space<vmem>>, vector<1x32x64xf32>
    %303 = vector.shape_cast %302 : vector<1x32x64xf32> to vector<32x64xf32>
    %cst_118 = arith.constant dense<0.000000e+00> : vector<16x64xf32>
    %304 = tpu.matmul %301, %303, %cst_118 {dimension_numbers = #tpu.dot_dimension_numbers<[1], [0], [0], [1], [0, 0, 1, 1], [], []>} : vector<16x32xf32>, vector<32x64xf32>, vector<16x64xf32> -> vector<16x64xf32>
    %c1_119 = arith.constant 1 : index
    %c0_120 = arith.constant 0 : index
    %c0_121 = arith.constant 0 : index
    %305 = vector.load %arg6[%c1_119, %c0_120, %c0_121] : memref<2x1x64xf32, #tpu.memory_space<vmem>>, vector<1x1x64xf32>
    %306 = vector.shape_cast %305 : vector<1x1x64xf32> to vector<1x64xf32>
    %307 = vector.broadcast %306 : vector<1x64xf32> to vector<16x64xf32>
    %308 = arith.addf %304, %307 : vector<16x64xf32>
    %cst_122 = arith.constant 0.000000e+00 : f32
    %309 = vector.broadcast %cst_122 : f32 to vector<16x64xf32>
    %310 = arith.maximumf %308, %309 : vector<16x64xf32>
    %c1_123 = arith.constant 1 : index
    %c0_124 = arith.constant 0 : index
    %c0_125 = arith.constant 0 : index
    %311 = vector.load %arg7[%c1_123, %c0_124, %c0_125] : memref<2x64x32xf32, #tpu.memory_space<vmem>>, vector<1x64x32xf32>
    %312 = vector.shape_cast %311 : vector<1x64x32xf32> to vector<64x32xf32>
    %cst_126 = arith.constant dense<0.000000e+00> : vector<16x32xf32>
    %313 = tpu.matmul %310, %312, %cst_126 {dimension_numbers = #tpu.dot_dimension_numbers<[1], [0], [0], [1], [0, 0, 1, 1], [], []>} : vector<16x64xf32>, vector<64x32xf32>, vector<16x32xf32> -> vector<16x32xf32>
    %c1_127 = arith.constant 1 : index
    %c0_128 = arith.constant 0 : index
    %c0_129 = arith.constant 0 : index
    %314 = vector.load %arg8[%c1_127, %c0_128, %c0_129] : memref<2x1x32xf32, #tpu.memory_space<vmem>>, vector<1x1x32xf32>
    %315 = vector.shape_cast %314 : vector<1x1x32xf32> to vector<1x32xf32>
    %316 = vector.broadcast %315 : vector<1x32xf32> to vector<16x32xf32>
    %317 = arith.addf %313, %316 : vector<16x32xf32>
    %318 = arith.addf %301, %317 : vector<16x32xf32>
    %c1_130 = arith.constant 1 : index
    %c0_131 = arith.constant 0 : index
    %c0_132 = arith.constant 0 : index
    %319 = vector.load %arg11[%c1_130, %c0_131, %c0_132] : memref<2x1x32xf32, #tpu.memory_space<vmem>>, vector<1x1x32xf32>
    %320 = vector.shape_cast %319 : vector<1x1x32xf32> to vector<1x32xf32>
    %c1_133 = arith.constant 1 : index
    %c0_134 = arith.constant 0 : index
    %c0_135 = arith.constant 0 : index
    %321 = vector.load %arg12[%c1_133, %c0_134, %c0_135] : memref<2x1x32xf32, #tpu.memory_space<vmem>>, vector<1x1x32xf32>
    %322 = vector.shape_cast %321 : vector<1x1x32xf32> to vector<1x32xf32>
    %cst_136 = arith.constant dense<0.000000e+00> : vector<16xf32>
    %323 = vector.multi_reduction <add>, %318, %cst_136 [1] : vector<16x32xf32> to vector<16xf32>
    %324 = vector.shape_cast %323 : vector<16xf32> to vector<16x1xf32>
    %cst_137 = arith.constant 3.200000e+01 : f32
    %325 = vector.broadcast %cst_137 : f32 to vector<16x1xf32>
    %326 = arith.divf %324, %325 : vector<16x1xf32>
    %327 = vector.broadcast %326 : vector<16x1xf32> to vector<16x32xf32>
    %328 = arith.subf %318, %327 : vector<16x32xf32>
    %329 = arith.mulf %328, %328 : vector<16x32xf32>
    %cst_138 = arith.constant dense<0.000000e+00> : vector<16xf32>
    %330 = vector.multi_reduction <add>, %329, %cst_138 [1] : vector<16x32xf32> to vector<16xf32>
    %331 = vector.shape_cast %330 : vector<16xf32> to vector<16x1xf32>
    %cst_139 = arith.constant 3.200000e+01 : f32
    %332 = vector.broadcast %cst_139 : f32 to vector<16x1xf32>
    %333 = arith.divf %331, %332 : vector<16x1xf32>
    %cst_140 = arith.constant 9.99999974E-6 : f32
    %334 = vector.broadcast %cst_140 : f32 to vector<16x1xf32>
    %335 = arith.addf %333, %334 : vector<16x1xf32>
    %336 = math.rsqrt %335 : vector<16x1xf32>
    %337 = vector.broadcast %336 : vector<16x1xf32> to vector<16x32xf32>
    %338 = arith.mulf %328, %337 : vector<16x32xf32>
    %339 = vector.broadcast %320 : vector<1x32xf32> to vector<16x32xf32>
    %340 = arith.mulf %338, %339 : vector<16x32xf32>
    %341 = vector.broadcast %322 : vector<1x32xf32> to vector<16x32xf32>
    %342 = arith.addf %340, %341 : vector<16x32xf32>
    %c0_141 = arith.constant 0 : index
    %c0_142 = arith.constant 0 : index
    %343 = vector.load %arg13[%c0_141, %c0_142] : memref<16x32xf32, #tpu.memory_space<vmem>>, vector<16x32xf32>
    tpu.vector_store %arg13[%c0_141, %c0_142], %342 {strides = array<i32>} : memref<16x32xf32, #tpu.memory_space<vmem>>, vector<16x32xf32>,
    return
  }
}

</mosaic_0001>

<bundles_post_ra>
// kernel: transformer_frame.1
= control target key start
LH: loop header
LB: loop body
LE: loop exit
PB: predicated region body
PF: predicated region fallthrough
CT: control target
= control target key end

     0   :  { %vm62_vm0 = vcmask 261120   ;;  %v4761_v6 = vmov 0.0   ;;  %vm4762_vm1 = vmmov 0   ;;  %s4763_s21 = smov 96   ;;  %vm147_vm2 = vcmask 64512   ;;  %s4764_s22 = smov 64   ;;  %s5386_s1 = inlined_call_operand.vmem [shape: f32[2,32,96], index: 1, kind: input, shape index: {}]   ;;  %s5387_s0 = inlined_call_operand.vmem [shape: f32[16,32], index: 0, kind: input, shape index: {}]   ;;  %s5388_s2 = inlined_call_operand.vmem [shape: f32[2,1,96], index: 2, kind: input, shape index: {}]   ;;  %s5389_s3 = inlined_call_operand.vmem [shape: f32[2,32,32], index: 3, kind: input, shape index: {}]   ;;  %s5390_s4 = inlined_call_operand.vmem [shape: f32[2,1,32], index: 4, kind: input, shape index: {}]   ;;  %s5391_s5 = inlined_call_operand.vmem [shape: f32[2,32,64], index: 5, kind: input, shape index: {}]   ;;  %s5392_s7 = inlined_call_operand.vmem [shape: f32[2,64,32], index: 7, kind: input, shape index: {}]   ;;  %s5393_s9 = inlined_call_operand.vmem [shape: f32[2,1,32], index: 9, kind: input, shape index: {}]   ;;  %s5394_s10 = inlined_call_operand.vmem [shape: f32[2,1,32], index: 10, kind: input, shape index: {}]   ;;  %s5395_s6 = inlined_call_operand.vmem [shape: f32[2,1,64], index: 6, kind: input, shape index: {}]   ;;  %s5396_s8 = inlined_call_operand.vmem [shape: f32[2,1,32], index: 8, kind: input, shape index: {}]   ;;  %s5397_s11 = inlined_call_operand.vmem [shape: f32[2,1,32], index: 11, kind: input, shape index: {}]   ;;  %s5398_s12 = inlined_call_operand.vmem [shape: f32[2,1,32], index: 12, kind: input, shape index: {}]   ;;  %s5399_s13 = inlined_call_operand.vmem [shape: f32[16,32], index: 13, kind: output, shape index: {}]  }
   0x1   :  { %v49_v0 = vld [vmem:[%s5386_s1 + $0x18] sm:$0xff]  ;;  %v48_v1 = vld [vmem:[%s5386_s1 + $0x10] sm:$0xff]  ;;  %v4853_v2 = vld [vmem:[%s5387_s0] sm:$0xff]  ;;  %4402 = vmatprep.subr.mxu1 %v4761_v6  ;;  %4404 = vmatprep.mubr.msk.f32.mxu1 %vm4762_vm1, %v4761_v6  ;;  %s4765_s23 = smov 120   ;;  %s4766_s24 = smov 88   ;;  %vm1955_vm3 = vcmask 523264  }
   0x2   :  { %4386 = vmatprep.subr.mxu0 %v49_v0  ;;  %v47_v3 = vld [vmem:[%s5386_s1 + $0x8] sm:$0xff]  ;;  %4394 = vmatprep.mubr.msk.f32.mxu0 %vm62_vm0, %v4853_v2  ;;  %v46_v4 = vld [vmem:[%s5386_s1] sm:$0xff]  ;;  %s4767_s25 = smov 56   ;;  %s4768_s26 = smov 112  }
   0x3   :  { %4387 = vmatpush3.msra.mxu0 %v49_v0  ;;  %v4866_v5 = vld [vmem:[%s5387_s0 + $0x8] sm:$0xff]  ;;  %v4134_v8 = vld [vmem:[%s5388_s2] ss:$0 sm:$0xff]  ;;  %s4769_s27 = smov 80   ;;  %s4770_s15 = smov 48  }
   0x4   :  { %4388 = vmatprep.subr.mxu0 %v48_v1  ;;  %v51_v63 = vld [vmem:[%s5389_s3] sm:$0xff]  ;;  %s4771_s16 = smov 72   ;;  %s4772_s17 = smov 104  }
   0x5   :  { %4389 = vmatpush3.msra.mxu0 %v48_v1  ;;  %s5400_s0 = smov 40  }
   0x6   :  { %4390 = vmatprep.subr.mxu0 %v47_v3 }
   0x7   :  { %4391 = vmatpush3.msra.mxu0 %v47_v3 }
   0x8   :  { %4392 = vmatprep.subr.mxu0 %v46_v4 }
   0x9   :  { %4393 = vmatpush3.msra.mxu0 %v46_v4 }
   0xa   :  { %4395 = vmatmul.mubr.msk.f32.vlgmr.msra.gmra.mxu0 %vm62_vm0, %v4866_v5  ;;  %4397 = vmatprep.subr.mxu0 %v4761_v6 }
   0xb   :  { %4399 = vmatprep.mubr.msk.f32.mxu0 %vm4762_vm1, %v4761_v6 }
  0xca   :  { %v4396_v7 = vpop.f32.mrf.mxu0 }
  0xcb   :  { %v4883_v11 = vadd.f32 %v4396_v7, %v4134_v8 }
  0xcc   :  { %v135_v9 = vpop.f32.mrf.mxu0 }
  0xcd   :  { %v4879_v10 = vadd.f32 %v4134_v8, %v135_v9 }
  0xcf   :  { %145 = vrot.lane.b32.xlu0 %v4879_v10, %s4763_s21 }
  0xd3   :  { %223 = vrot.lane.b32.xlu0 %v4883_v11, %s4763_s21 }
 0x141   :  { %v146_v12 = vpop.permute.xlu0 %145 }
 0x142   :  { %4398 = vmatpush3.xpose.msk.msra.mxu0 %vm147_vm2, %v146_v12 }
 0x143   :  { %4407 = vmatprep.subr.mxu0 %v4761_v6 }
 0x145   :  { %4400 = vmatmul.mubr.msk.f32.vlgmr.msra.gmra.mxu0 %vm147_vm2, %v4879_v10  ;;  %v224_v13 = vpop.permute.xlu0 %223 }
 0x146   :  { %4403 = vmatpush3.xpose.msk.msra.mxu1 %vm147_vm2, %v224_v13  ;;  %4409 = vmatprep.mubr.msk.f32.mxu0 %vm4762_vm1, %v4761_v6 }
 0x147   :  { %4412 = vmatprep.subr.mxu1 %v4761_v6 }
 0x149   :  { %4405 = vmatmul.mubr.msk.f32.vlgmr.msra.gmra.mxu1 %vm147_vm2, %v4883_v11 }
 0x14a   :  { %4414 = vmatprep.mubr.msk.f32.mxu1 %vm4762_vm1, %v4761_v6 }
 0x205   :  { %v218_v14 = vpop.f32.mrf.mxu0 }
 0x206   :  { %v299_v15 = vsel %vm147_vm2, %v218_v14, -inf }
 0x207   :  { %300 = vmax.xlane.f32.xlu1 %v299_v15  ;;  %v4401_v16 = vpop.f32.mrf.mxu0  ;;  %v52_v15 = vld [vmem:[%s5389_s3 + $0x8] sm:$0xff] }
 0x209   :  { %v295_v17 = vpop.f32.mrf.mxu1 }
 0x20a   :  { %v302_v18 = vsel %vm147_vm2, %v295_v17, -inf }
 0x20b   :  { %303 = vmax.xlane.f32.xlu1 %v302_v18  ;;  %v4406_v19 = vpop.f32.mrf.mxu1 }
 0x290   :  { %v301_v20 = vpop.xlane.xlu1 %300 }
 0x291   :  { %v305_v21 = vsub.f32 %v218_v14, %v301_v20 }
 0x293   :  { %v307_v22 = vmul.f32 1.442695, %v305_v21 }
 0x294   :  { %v304_v23 = vpop.xlane.xlu1 %303 }
 0x295   :  { %4681 = vpow2.f32 %v307_v22  ;;  %v306_v24 = vsub.f32 %v295_v17, %v304_v23 }
 0x297   :  { %v309_v25 = vmul.f32 1.442695, %v306_v24 }
 0x299   :  { %4683 = vpow2.f32 %v309_v25 }
 0x2a2   :  { %v4682_v26 = vpop.eup %4681 }
 0x2a3   :  { %v311_v27 = vsel %vm147_vm2, %v4682_v26, 0.0 }
 0x2a4   :  { %312 = vadd.xlane.f32.xlu0 %v311_v27 }
 0x2a6   :  { %v4684_v28 = vpop.eup %4683 }
 0x2a7   :  { %v314_v29 = vsel %vm147_vm2, %v4684_v28, 0.0 }
 0x2a8   :  { %315 = vadd.xlane.f32.xlu1 %v314_v29 }
 0x2b9   :  { %321 = vrot.lane.b32.xlu1 %v4879_v10, %s4764_s22 }
 0x2ba   :  { %473 = vrot.lane.b32.xlu0 %v4879_v10, %s4765_s23 }
 0x2bd   :  { %397 = vrot.lane.b32.xlu1 %v4883_v11, %s4764_s22 }
 0x2c1   :  { %475 = vrot.lane.b32.xlu1 %v4879_v10, %s4766_s24 }
 0x2c5   :  { %553 = vrot.lane.b32.xlu1 %v4883_v11, %s4766_s24 }
 0x2c9   :  { %551 = vrot.lane.b32.xlu1 %v4883_v11, %s4765_s23 }
 0x32d   :  { %v313_v30 = vpop.xlane.xlu0 %312 }
 0x32e   :  { %4685 = vrcp.f32 %v313_v30 }
 0x331   :  { %v316_v31 = vpop.xlane.xlu1 %315  ;;  %v474_v39 = vpop.permute.xlu0 %473 }
 0x332   :  { %4687 = vrcp.f32 %v316_v31 }
 0x335   :  { %v322_v32 = vpop.permute.xlu1 %321 }
 0x336   :  { %4408 = vmatpush3.msra.mxu0 %v322_v32 }
 0x337   :  { %4417 = vmatprep.subr.mxu0 %v4761_v6 }
 0x339   :  { %v398_v33 = vpop.permute.xlu1 %397 }
 0x33a   :  { %4413 = vmatpush3.msra.mxu1 %v398_v33 }
 0x33b   :  { %v4686_v34 = vpop.eup %4685  ;;  %4422 = vmatprep.subr.mxu1 %v4761_v6 }
 0x33c   :  { %v319_v35 = vmul.f32 %v4686_v34, %v4682_v26 }
 0x33d   :  { %v476_v36 = vpop.permute.xlu1 %475 }
 0x33e   :  { %4410 = vmatmul.mubr.msk.f32.vlgmr.msra.gmra.mxu0 %vm147_vm2, %v319_v35 }
 0x33f   :  { %v4688_v37 = vpop.eup %4687  ;;  %4418 = vmatpush3.xpose.msk.msra.mxu0 %vm147_vm2, %v476_v36  ;;  %4419 = vmatprep.mubr.msk.f32.mxu0 %vm4762_vm1, %v4761_v6 }
 0x340   :  { %v320_v38 = vmul.f32 %v4688_v37, %v4684_v28  ;;  %4427 = vmatprep.subr.mxu0 %v4761_v6 }
 0x341   :  { %v554_v40 = vpop.permute.xlu1 %553 }
 0x342   :  { %4415 = vmatmul.mubr.msk.f32.vlgmr.msra.gmra.mxu1 %vm147_vm2, %v320_v38  ;;  %4420 = vmatmul.mubr.msk.f32.vlgmr.msra.gmra.mxu0 %vm147_vm2, %v474_v39 }
 0x343   :  { %4423 = vmatpush3.xpose.msk.msra.mxu1 %vm147_vm2, %v554_v40  ;;  %4424 = vmatprep.mubr.msk.f32.mxu1 %vm4762_vm1, %v4761_v6 }
 0x344   :  { %4432 = vmatprep.subr.mxu1 %v4761_v6  ;;  %4429 = vmatprep.mubr.msk.f32.mxu0 %vm4762_vm1, %v4761_v6 }
 0x345   :  { %v552_v41 = vpop.permute.xlu1 %551 }
 0x346   :  { %4425 = vmatmul.mubr.msk.f32.vlgmr.msra.gmra.mxu1 %vm147_vm2, %v552_v41 }
 0x347   :  { %4434 = vmatprep.mubr.msk.f32.mxu1 %vm4762_vm1, %v4761_v6 }
 0x3fe   :  { %v393_v42 = vpop.f32.mrf.mxu0 }
 0x400   :  { %v4411_v43 = vpop.f32.mrf.mxu0 }
 0x402   :  { %v469_v44 = vpop.f32.mrf.mxu1  ;;  %v547_v45 = vpop.f32.mrf.mxu0 }
 0x403   :  { %v629_v46 = vsel %vm147_vm2, %v547_v45, -inf }
 0x404   :  { %v4416_v47 = vpop.f32.mrf.mxu1  ;;  %630 = vmax.xlane.f32.xlu1 %v629_v46  ;;  %v4421_v48 = vpop.f32.mrf.mxu0 }
 0x406   :  { %v625_v49 = vpop.f32.mrf.mxu1 }
 0x407   :  { %v632_v50 = vsel %vm147_vm2, %v625_v49, -inf }
 0x408   :  { %633 = vmax.xlane.f32.xlu0 %v632_v50  ;;  %v4426_v51 = vpop.f32.mrf.mxu1 }
 0x409   :  { %v53_v51 = vld [vmem:[%s5389_s3 + $0x10] sm:$0xff] }
 0x41e   :  { %727 = vrot.lane.b32.xlu0 %v4883_v11, %s4767_s25 }
 0x422   :  { %965 = vrot.lane.b32.xlu0 %v4879_v10, %s4768_s26 }
 0x48d   :  { %v631_v52 = vpop.xlane.xlu1 %630 }
 0x48e   :  { %v635_v53 = vsub.f32 %v547_v45, %v631_v52 }
 0x490   :  { %v637_v56 = vmul.f32 1.442695, %v635_v53 }
 0x491   :  { %v634_v54 = vpop.xlane.xlu0 %633 }
 0x492   :  { %v636_v55 = vsub.f32 %v625_v49, %v634_v54 }
 0x494   :  { %v639_v57 = vmul.f32 1.442695, %v636_v55 }
 0x495   :  { %v728_v58 = vpop.permute.xlu0 %727 }
 0x496   :  { %4689 = vpow2.f32 %v639_v57  ;;  %4433 = vmatpush3.msra.mxu1 %v728_v58 }
 0x497   :  { %4691 = vpow2.f32 %v637_v56  ;;  %4442 = vmatprep.subr.mxu1 %v51_v63 }
 0x499   :  { %v966_v23 = vpop.permute.xlu0 %965 }
 0x4a3   :  { %v4690_v59 = vpop.eup %4689 }
 0x4a4   :  { %v644_v60 = vsel %vm147_vm2, %v4690_v59, 0.0  ;;  %v4692_v61 = vpop.eup %4691 }
 0x4a5   :  { %645 = vadd.xlane.f32.xlu1 %v644_v60  ;;  %v641_v62 = vsel %vm147_vm2, %v4692_v61, 0.0 }
 0x4a9   :  { %642 = vadd.xlane.f32.xlu1 %v641_v62 }
 0x4ba   :  { %651 = vrot.lane.b32.xlu1 %v4879_v10, %s4767_s25 }
 0x4be   :  { %967 = vrot.lane.b32.xlu1 %v4879_v10, %s4769_s27 }
 0x4c2   :  { %1045 = vrot.lane.b32.xlu1 %v4883_v11, %s4769_s27 }
 0x4c6   :  { %1043 = vrot.lane.b32.xlu1 %v4883_v11, %s4768_s26 }
 0x52e   :  { %v646_v0 = vpop.xlane.xlu1 %645 }
 0x52f   :  { %4693 = vrcp.f32 %v646_v0 }
 0x532   :  { %v643_v1 = vpop.xlane.xlu1 %642 }
 0x533   :  { %4695 = vrcp.f32 %v643_v1 }
 0x536   :  { %v652_v3 = vpop.permute.xlu1 %651 }
 0x537   :  { %4428 = vmatpush3.msra.mxu0 %v652_v3 }
 0x538   :  { %4437 = vmatprep.subr.mxu0 %v52_v15 }
 0x53a   :  { %v968_v4 = vpop.permute.xlu1 %967 }
 0x53c   :  { %v4694_v7 = vpop.eup %4693 }
 0x53d   :  { %v650_v8 = vmul.f32 %v4694_v7, %v4690_v59 }
 0x53e   :  { %v1046_v12 = vpop.permute.xlu1 %1045 }
 0x53f   :  { %4435 = vmatmul.mubr.msk.f32.vlgmr.msra.gmra.mxu1 %vm147_vm2, %v650_v8 }
 0x540   :  { %v4696_v9 = vpop.eup %4695  ;;  %4444 = vmatprep.mubr.msk.f32.mxu1 %vm147_vm2, %v393_v42  ;;  %4443 = vmatpush3.msra.mxu1 %v51_v63 }
 0x541   :  { %4452 = vmatprep.subr.mxu1 %v4761_v6  ;;  %v649_v13 = vmul.f32 %v4696_v9, %v4692_v61 }
 0x542   :  { %v1044_v14 = vpop.permute.xlu1 %1043 }
 0x543   :  { %4430 = vmatmul.mubr.msk.f32.vlgmr.msra.gmra.mxu0 %vm147_vm2, %v649_v13  ;;  %4445 = vmatmul.mubr.msk.f32.vlgmr.msra.gmra.mxu1 %vm147_vm2, %v469_v44 }
 0x544   :  { %4453 = vmatpush3.xpose.msk.msra.mxu1 %vm147_vm2, %v1046_v12  ;;  %4454 = vmatprep.mubr.msk.f32.mxu1 %vm4762_vm1, %v4761_v6 }
 0x545   :  { %4462 = vmatprep.subr.mxu1 %v4761_v6  ;;  %4438 = vmatpush3.msra.mxu0 %v52_v15 }
 0x546   :  { %4447 = vmatprep.subr.mxu0 %v4761_v6 }
 0x547   :  { %4455 = vmatmul.mubr.msk.f32.vlgmr.msra.gmra.mxu1 %vm147_vm2, %v1044_v14 }
 0x548   :  { %4464 = vmatprep.mubr.msk.f32.mxu1 %vm4762_vm1, %v4761_v6 }
 0x5ff   :  { %v799_v16 = vpop.f32.mrf.mxu1 }
 0x601   :  { %v4436_v17 = vpop.f32.mrf.mxu1 }
 0x603   :  { %v723_v18 = vpop.f32.mrf.mxu0  ;;  %v4968_v19 = vpop.f32.mrf.mxu1 }
 0x604   :  { %4439 = vmatprep.mubr.msk.f32.mxu0 %vm147_vm2, %v723_v18 }
 0x605   :  { %v4431_v20 = vpop.f32.mrf.mxu0  ;;  %4440 = vmatmul.mubr.msk.f32.vlgmr.msra.gmra.mxu0 %vm147_vm2, %v799_v16  ;;  %v4972_v21 = vpop.f32.mrf.mxu1 }
 0x606   :  { %4448 = vmatpush3.xpose.msk.msra.mxu0 %vm147_vm2, %v968_v4  ;;  %4449 = vmatprep.mubr.msk.f32.mxu0 %vm4762_vm1, %v4761_v6 }
 0x607   :  { %v1117_v22 = vpop.f32.mrf.mxu1  ;;  %4457 = vmatprep.subr.mxu0 %v4761_v6 }
 0x608   :  { %v1124_v24 = vsel %vm147_vm2, %v1117_v22, -inf }
 0x609   :  { %1125 = vmax.xlane.f32.xlu1 %v1124_v24  ;;  %4450 = vmatmul.mubr.msk.f32.vlgmr.msra.gmra.mxu0 %vm147_vm2, %v966_v23  ;;  %v4456_v25 = vpop.f32.mrf.mxu1 }
 0x60a   :  { %4459 = vmatprep.mubr.msk.f32.mxu0 %vm4762_vm1, %v4761_v6 }
 0x61a   :  { %1143 = vrot.lane.b32.xlu1 %v4879_v10, %s4770_s15 }
 0x61e   :  { %1380 = vrot.lane.b32.xlu1 %v4879_v10, %s4771_s16 }
 0x622   :  { %1458 = vrot.lane.b32.xlu1 %v4883_v11, %s4771_s16 }
 0x626   :  { %1456 = vrot.lane.b32.xlu1 %v4883_v11, %s4772_s17 }
 0x692   :  { %v1126_v26 = vpop.xlane.xlu1 %1125 }
 0x693   :  { %v1128_v28 = vsub.f32 %v1117_v22, %v1126_v26 }
 0x695   :  { %v1131_v29 = vmul.f32 1.442695, %v1128_v28 }
 0x696   :  { %v1144_v27 = vpop.permute.xlu1 %1143 }
 0x697   :  { %4458 = vmatpush3.msra.mxu0 %v1144_v27  ;;  %4697 = vpow2.f32 %v1131_v29 }
 0x698   :  { %4467 = vmatprep.subr.mxu0 %v53_v51 }
 0x69a   :  { %v1381_v47 = vpop.permute.xlu1 %1380 }
 0x69e   :  { %v1459_v57 = vpop.permute.xlu1 %1458 }
 0x6a2   :  { %v1457_v60 = vpop.permute.xlu1 %1456 }
 0x6a4   :  { %v4698_v34 = vpop.eup %4697 }
 0x6a5   :  { %v1136_v36 = vsel %vm147_vm2, %v4698_v34, 0.0 }
 0x6c5   :  { %v4990_v30 = vpop.f32.mrf.mxu0 }
 0x6c6   :  { %v962_v3 = vadd.f32 %v4968_v19, %v4990_v30 }
 0x6c7   :  { %v4992_v31 = vpop.f32.mrf.mxu0 }
 0x6c8   :  { %v957_v7 = vadd.f32 %v4972_v21, %v4992_v31 }
 0x6c9   :  { %v1039_v32 = vpop.f32.mrf.mxu0 }
 0x6ca   :  { %v1121_v33 = vsel %vm147_vm2, %v1039_v32, -inf }
 0x6cb   :  { %1122 = vmax.xlane.f32.xlu0 %v1121_v33  ;;  %v4451_v35 = vpop.f32.mrf.mxu0 }
 0x6cf   :  { %1137 = vadd.xlane.f32.xlu0 %v1136_v36 }
 0x754   :  { %v1123_v37 = vpop.xlane.xlu0 %1122 }
 0x755   :  { %v1127_v38 = vsub.f32 %v1039_v32, %v1123_v37  ;;  %v4169_v32 = vld [vmem:[%s5390_s4] ss:$0 sm:$0xff] }
 0x757   :  { %v1129_v39 = vmul.f32 1.442695, %v1127_v38 }
 0x758   :  { %v1138_v42 = vpop.xlane.xlu0 %1137 }
 0x759   :  { %4699 = vpow2.f32 %v1129_v39 }
 0x75a   :  { %4701 = vrcp.f32 %v1138_v42 }
 0x766   :  { %v4700_v40 = vpop.eup %4699 }
 0x767   :  { %v1133_v41 = vsel %vm147_vm2, %v4700_v40, 0.0  ;;  %v4702_v44 = vpop.eup %4701 }
 0x768   :  { %1134 = vadd.xlane.f32.xlu0 %v1133_v41  ;;  %v1142_v46 = vmul.f32 %v4702_v44, %v4698_v34 }
 0x77e   :  { %1219 = vrot.lane.b32.xlu0 %v4883_v11, %s4770_s15 }
 0x782   :  { %1378 = vrot.lane.b32.xlu0 %v4879_v10, %s4772_s17 }
 0x7f1   :  { %v1135_v43 = vpop.xlane.xlu0 %1134 }
 0x7f2   :  { %4703 = vrcp.f32 %v1135_v43 }
 0x7f5   :  { %v1220_v45 = vpop.permute.xlu0 %1219 }
 0x7f6   :  { %4463 = vmatpush3.msra.mxu1 %v1220_v45 }
 0x7f7   :  { %4465 = vmatmul.mubr.msk.f32.vlgmr.msra.gmra.mxu1 %vm147_vm2, %v1142_v46  ;;  %4472 = vmatprep.subr.mxu1 %v4761_v6 }
 0x7f8   :  { %4473 = vmatpush3.xpose.msk.msra.mxu1 %vm147_vm2, %v1381_v47  ;;  %4474 = vmatprep.mubr.msk.f32.mxu1 %vm4762_vm1, %v4761_v6 }
 0x7f9   :  { %v1379_v48 = vpop.permute.xlu0 %1378  ;;  %4482 = vmatprep.subr.mxu1 %v4761_v6 }
 0x7fb   :  { %4475 = vmatmul.mubr.msk.f32.vlgmr.msra.gmra.mxu1 %vm147_vm2, %v1379_v48 }
 0x7fc   :  { %4484 = vmatprep.mubr.msk.f32.mxu1 %vm4762_vm1, %v4761_v6 }
 0x7ff   :  { %v4704_v49 = vpop.eup %4703 }
 0x800   :  { %v1141_v50 = vmul.f32 %v4704_v49, %v4700_v40 }
 0x802   :  { %4460 = vmatmul.mubr.msk.f32.vlgmr.msra.gmra.mxu0 %vm147_vm2, %v1141_v50 }
 0x803   :  { %4468 = vmatpush3.msra.mxu0 %v53_v51 }
 0x804   :  { %4477 = vmatprep.subr.mxu0 %v4761_v6 }
 0x8b7   :  { %v1291_v52 = vpop.f32.mrf.mxu1 }
 0x8b9   :  { %v4466_v53 = vpop.f32.mrf.mxu1 }
 0x8ba   :  { %v1847_v53 = vld [vmem:[%s5391_s5 + $0x8] sm:$0xff] }
 0x8bb   :  { %v1452_v54 = vpop.f32.mrf.mxu1 }
 0x8bc   :  { %v1534_v55 = vsel %vm147_vm2, %v1452_v54, -inf }
 0x8bd   :  { %1535 = vmax.xlane.f32.xlu0 %v1534_v55  ;;  %v4476_v56 = vpop.f32.mrf.mxu1  ;;  %v1947_v55 = vld [vmem:[%s5392_s7 + $0x38] sm:$0xff] }
 0x8be   :  { %v1946_v56 = vld [vmem:[%s5392_s7 + $0x30] sm:$0xff] }
 0x8c2   :  { %v1215_v58 = vpop.f32.mrf.mxu0 }
 0x8c3   :  { %4469 = vmatprep.mubr.msk.f32.mxu0 %vm147_vm2, %v1215_v58  ;;  %v1944_v58 = vld [vmem:[%s5392_s7 + $0x20] sm:$0xff] }
 0x8c4   :  { %v4461_v59 = vpop.f32.mrf.mxu0  ;;  %4470 = vmatmul.mubr.msk.f32.vlgmr.msra.gmra.mxu0 %vm147_vm2, %v1291_v52  ;;  %v1848_v52 = vld [vmem:[%s5391_s5 + $0x10] sm:$0xff] }
 0x8c5   :  { %4478 = vmatpush3.xpose.msk.msra.mxu0 %vm147_vm2, %v1459_v57  ;;  %4479 = vmatprep.mubr.msk.f32.mxu0 %vm4762_vm1, %v4761_v6  ;;  %v1945_v57 = vld [vmem:[%s5392_s7 + $0x28] sm:$0xff] }
 0x8c6   :  { %4487 = vmatprep.subr.mxu0 %v4761_v6 }
 0x8c8   :  { %4480 = vmatmul.mubr.msk.f32.vlgmr.msra.gmra.mxu0 %vm147_vm2, %v1457_v60 }
 0x8c9   :  { %4489 = vmatprep.mubr.msk.f32.mxu0 %vm4762_vm1, %v4761_v6 }
 0x946   :  { %v1536_v61 = vpop.xlane.xlu0 %1535 }
 0x947   :  { %v1540_v62 = vsub.f32 %v1452_v54, %v1536_v61  ;;  %v1846_v54 = vld [vmem:[%s5391_s5] sm:$0xff] }
 0x949   :  { %v1542_v63 = vmul.f32 1.442695, %v1540_v62 }
 0x94b   :  { %4705 = vpow2.f32 %v1542_v63 }
 0x958   :  { %v4706_v0 = vpop.eup %4705 }
 0x959   :  { %v1546_v1 = vsel %vm147_vm2, %v4706_v0, 0.0 }
 0x95a   :  { %1547 = vadd.xlane.f32.xlu0 %v1546_v1 }
 0x984   :  { %v4471_v4 = vpop.f32.mrf.mxu0 }
 0x985   :  { %v1377_v8 = vadd.f32 %v4471_v4, %v962_v3  ;;  %v4170_v3 = vld [vmem:[%s5393_s9] ss:$0 sm:$0xff] }
 0x986   :  { %v1367_v9 = vpop.f32.mrf.mxu0 }
 0x987   :  { %v1376_v12 = vadd.f32 %v1367_v9, %v957_v7 }
 0x988   :  { %v1530_v13 = vpop.f32.mrf.mxu0 }
 0x989   :  { %v1537_v14 = vsel %vm147_vm2, %v1530_v13, -inf }
 0x98a   :  { %1538 = vmax.xlane.f32.xlu1 %v1537_v14  ;;  %v4481_v15 = vpop.f32.mrf.mxu0 }
 0x99b   :  { %1556 = vrot.lane.b32.xlu1 %v4879_v10, %s5400_s0  ;;  %v54_v10 = vld [vmem:[%s5389_s3 + $0x18] sm:$0xff] }
 0x9e3   :  { %v1548_v16 = vpop.xlane.xlu0 %1547 }
 0x9e4   :  { %4707 = vrcp.f32 %v1548_v16  ;;  %v1943_v16 = vld [vmem:[%s5392_s7 + $0x18] sm:$0xff] }
 0x9f1   :  { %v4708_v18 = vpop.eup %4707 }
 0x9f2   :  { %v1554_v21 = vmul.f32 %v4708_v18, %v4706_v0  ;;  %v1941_v18 = vld [vmem:[%s5392_s7 + $0x8] sm:$0xff] }
 0xa13   :  { %v1539_v17 = vpop.xlane.xlu1 %1538 }
 0xa14   :  { %v1541_v19 = vsub.f32 %v1530_v13, %v1539_v17  ;;  %v1942_v17 = vld [vmem:[%s5392_s7 + $0x10] sm:$0xff] }
 0xa16   :  { %v1544_v20 = vmul.f32 1.442695, %v1541_v19  ;;  %v1940_v19 = vld [vmem:[%s5392_s7] sm:$0xff] }
 0xa17   :  { %v1557_v22 = vpop.permute.xlu1 %1556 }
 0xa18   :  { %4709 = vpow2.f32 %v1544_v20  ;;  %4483 = vmatpush3.msra.mxu1 %v1557_v22  ;;  %v4172_v20 = vld [vmem:[%s5395_s6] ss:$0 sm:$0xff] }
 0xa19   :  { %4485 = vmatmul.mubr.msk.f32.vlgmr.msra.gmra.mxu1 %vm147_vm2, %v1554_v21  ;;  %4492 = vmatprep.subr.mxu1 %v54_v10 }
 0xa1a   :  { %4493 = vmatpush3.msra.mxu1 %v54_v10 }
 0xa1b   :  { %4508 = vmatprep.subr.mxu1 %v1947_v55 }
 0xa25   :  { %v4710_v23 = vpop.eup %4709 }
 0xa26   :  { %v1549_v24 = vsel %vm147_vm2, %v4710_v23, 0.0 }
 0xa27   :  { %1550 = vadd.xlane.f32.xlu0 %v1549_v24 }
 0xa3d   :  { %1632 = vrot.lane.b32.xlu0 %v4883_v11, %s5400_s0 }
 0xab0   :  { %v1551_v25 = vpop.xlane.xlu0 %1550 }
 0xab1   :  { %4711 = vrcp.f32 %v1551_v25 }
 0xab4   :  { %v1633_v26 = vpop.permute.xlu0 %1632 }
 0xab5   :  { %4488 = vmatpush3.msra.mxu0 %v1633_v26  ;;  %v4175_v26 = vld [vmem:[%s5396_s8] ss:$0 sm:$0xff] }
 0xabe   :  { %v4712_v27 = vpop.eup %4711 }
 0xabf   :  { %v1555_v28 = vmul.f32 %v4712_v27, %v4710_v23 }
 0xac1   :  { %4490 = vmatmul.mubr.msk.f32.vlgmr.msra.gmra.mxu0 %vm147_vm2, %v1555_v28 }
 0xad9   :  { %v1628_v29 = vpop.f32.mrf.mxu1 }
 0xada   :  { %4494 = vmatprep.mubr.msk.f32.mxu1 %vm147_vm2, %v1628_v29 }
 0xadb   :  { %v4486_v30 = vpop.f32.mrf.mxu1 }
 0xb81   :  { %v1704_v31 = vpop.f32.mrf.mxu0 }
 0xb82   :  { %4495 = vmatmul.mubr.msk.f32.vlgmr.msra.gmra.mxu1 %vm147_vm2, %v1704_v31 }
 0xb83   :  { %v4491_v11 = vpop.f32.mrf.mxu0  ;;  %4509 = vmatpush3.msra.mxu1 %v1947_v55 }
 0xb84   :  { %4510 = vmatprep.subr.mxu1 %v1946_v56 }
 0xb85   :  { %4511 = vmatpush3.msra.mxu1 %v1946_v56 }
 0xb86   :  { %4512 = vmatprep.subr.mxu1 %v1945_v57 }
 0xb87   :  { %4513 = vmatpush3.msra.mxu1 %v1945_v57 }
 0xb88   :  { %4514 = vmatprep.subr.mxu1 %v1944_v58 }
 0xb89   :  { %4515 = vmatpush3.msra.mxu1 %v1944_v58  ;;  %v4179_v58 = vld [vmem:[%s5398_s12] ss:$0 sm:$0xff] }
 0xb8a   :  { %4516 = vmatprep.subr.mxu1 %v1943_v16 }
 0xb8b   :  { %4517 = vmatpush3.msra.mxu1 %v1943_v16 }
 0xb8c   :  { %4518 = vmatprep.subr.mxu1 %v1942_v17 }
 0xb8d   :  { %4519 = vmatpush3.msra.mxu1 %v1942_v17 }
 0xb8e   :  { %4520 = vmatprep.subr.mxu1 %v1941_v18 }
 0xb8f   :  { %4521 = vmatpush3.msra.mxu1 %v1941_v18 }
 0xb90   :  { %4522 = vmatprep.subr.mxu1 %v1940_v19 }
 0xb91   :  { %4523 = vmatpush3.msra.mxu1 %v1940_v19 }
 0xb92   :  { %4543 = vmatprep.subr.mxu1 %v4761_v6 }
 0xc42   :  { %v4496_v33 = vpop.f32.mrf.mxu1 }
 0xc43   :  { %v1790_v34 = vadd.f32 %v4496_v33, %v1377_v8 }
 0xc44   :  { %v1780_v35 = vpop.f32.mrf.mxu1 }
 0xc45   :  { %v1798_v36 = vadd.f32 %v4169_v32, %v1790_v34  ;;  %v1789_v37 = vadd.f32 %v1780_v35, %v1376_v12  ;;  %v4171_v12 = vld [vmem:[%s5394_s10] ss:$0 sm:$0xff] }
 0xc47   :  { %v1797_v38 = vadd.f32 %v4169_v32, %v1789_v37  ;;  %v1800_v39 = vadd.f32 %v1798_v36, %v4866_v5 }
 0xc49   :  { %v1806_v40 = vsel %vm62_vm0, %v1800_v39, 0.0  ;;  %v1799_v41 = vadd.f32 %v1797_v38, %v4853_v2  ;;  %v1849_v2 = vld [vmem:[%s5391_s5 + $0x18] sm:$0xff] }
 0xc4a   :  { %1807 = vadd.xlane.f32.xlu0 %v1806_v40  ;;  %4497 = vmatprep.subr.mxu0 %v1849_v2 }
 0xc4b   :  { %v1803_v42 = vsel %vm62_vm0, %v1799_v41, 0.0  ;;  %4498 = vmatpush3.msra.mxu0 %v1849_v2 }
 0xc4c   :  { %1804 = vadd.xlane.f32.xlu1 %v1803_v42  ;;  %4499 = vmatprep.subr.mxu0 %v1848_v52 }
 0xc4d   :  { %4500 = vmatpush3.msra.mxu0 %v1848_v52 }
 0xc4e   :  { %4501 = vmatprep.subr.mxu0 %v1847_v53 }
 0xc4f   :  { %4502 = vmatpush3.msra.mxu0 %v1847_v53  ;;  %v4178_v53 = vld [vmem:[%s5397_s11] ss:$0 sm:$0xff] }
 0xc50   :  { %4503 = vmatprep.subr.mxu0 %v1846_v54 }
 0xc51   :  { %4504 = vmatpush3.msra.mxu0 %v1846_v54 }
 0xcd3   :  { %v1808_v43 = vpop.xlane.xlu0 %1807 }
 0xcd4   :  { %v1811_v44 = vmul.f32 0.03125, %v1808_v43 }
 0xcd5   :  { %v1805_v45 = vpop.xlane.xlu1 %1804 }
 0xcd6   :  { %v1813_v46 = vsub.f32 %v1800_v39, %v1811_v44  ;;  %v1810_v47 = vmul.f32 0.03125, %v1805_v45  ;;  %v4183_v44 = vld [vmem:[%s5386_s1 + $0x38] sm:$0xff]  ;;  %v4182_v45 = vld [vmem:[%s5386_s1 + $0x30] sm:$0xff] }
 0xcd7   :  { %4527 = vmatprep.subr.mxu0 %v4183_v44 }
 0xcd8   :  { %v1812_v48 = vsub.f32 %v1799_v41, %v1810_v47  ;;  %v1815_v49 = vmul.f32 %v1813_v46, %v1813_v46  ;;  %v4180_v47 = vld [vmem:[%s5386_s1 + $0x20] sm:$0xff] }
 0xcda   :  { %v1819_v50 = vsel %vm62_vm0, %v1815_v49, 0.0  ;;  %v1814_v51 = vmul.f32 %v1812_v48, %v1812_v48 }
 0xcdb   :  { %1820 = vadd.xlane.f32.xlu0 %v1819_v50 }
 0xcdc   :  { %v1816_v5 = vsel %vm62_vm0, %v1814_v51, 0.0 }
 0xcdd   :  { %1817 = vadd.xlane.f32.xlu1 %v1816_v5 }
 0xd64   :  { %v1821_v59 = vpop.xlane.xlu0 %1820 }
 0xd65   :  { %v1823_v60 = vmul.f32 0.03125, %v1821_v59 }
 0xd66   :  { %v1818_v61 = vpop.xlane.xlu1 %1817 }
 0xd67   :  { %v1825_v62 = vadd.f32 1e-05, %v1823_v60  ;;  %v1822_v63 = vmul.f32 0.03125, %v1818_v61 }
 0xd69   :  { %4713 = vrsqrt.f32 %v1825_v62  ;;  %v1824_v0 = vadd.f32 1e-05, %v1822_v63  ;;  %v4190_v62 = vld [vmem:[%s5388_s2 + $0x1] ss:$0 sm:$0xff] }
 0xd6b   :  { %4715 = vrsqrt.f32 %v1824_v0 }
 0xd76   :  { %v4714_v1 = vpop.eup %4713 }
 0xd77   :  { %v1829_v4 = vmul.f32 %v4714_v1, %v1813_v46  ;;  %v4181_v46 = vld [vmem:[%s5386_s1 + $0x28] sm:$0xff] }
 0xd78   :  { %v4716_v7 = vpop.eup %4715 }
 0xd79   :  { %v1828_v8 = vmul.f32 %v4716_v7, %v1812_v48  ;;  %v1837_v9 = vmul.f32 %v4170_v3, %v1829_v4 }
 0xd7b   :  { %v1836_v13 = vmul.f32 %v4170_v3, %v1828_v8  ;;  %v1845_v15 = vadd.f32 %v4171_v12, %v1837_v9 }
 0xd7d   :  { %v1844_v14 = vadd.f32 %v4171_v12, %v1836_v13 }
 0xd7f   :  { %4505 = vmatprep.mubr.msk.f32.mxu0 %vm62_vm0, %v1844_v14 }
 0xd80   :  { %4506 = vmatmul.mubr.msk.f32.vlgmr.msra.gmra.mxu0 %vm62_vm0, %v1845_v15 }
 0xd81   :  { %4528 = vmatpush3.msra.mxu0 %v4183_v44 }
 0xd82   :  { %4529 = vmatprep.subr.mxu0 %v4182_v45 }
 0xd83   :  { %4530 = vmatpush3.msra.mxu0 %v4182_v45 }
 0xd84   :  { %4531 = vmatprep.subr.mxu0 %v4181_v46 }
 0xd85   :  { %4532 = vmatpush3.msra.mxu0 %v4181_v46 }
 0xd86   :  { %4533 = vmatprep.subr.mxu0 %v4180_v47 }
 0xd87   :  { %4534 = vmatpush3.msra.mxu0 %v4180_v47 }
 0xd88   :  { %4538 = vmatprep.subr.mxu0 %v4761_v6 }
 0xe40   :  { %v4507_v22 = vpop.f32.mrf.mxu0 }
 0xe41   :  { %v1935_v21 = vadd.f32 %v4507_v22, %v4172_v20 }
 0xe42   :  { %v1929_v23 = vpop.f32.mrf.mxu0 }
 0xe43   :  { %v1930_v24 = vadd.f32 %v4172_v20, %v1929_v23  ;;  %v1939_v25 = vmax.f32 %v1935_v21, 0.0 }
 0xe45   :  { %v1938_v10 = vmax.f32 %v1930_v24, 0.0 }
 0xe47   :  { %4524 = vmatprep.mubr.msk.f32.mxu1 %vm1955_vm3, %v1938_v10 }
 0xe48   :  { %4525 = vmatmul.mubr.msk.f32.vlgmr.msra.gmra.mxu1 %vm1955_vm3, %v1939_v25 }
 0xe49   :  { %4545 = vmatprep.mubr.msk.f32.mxu1 %vm4762_vm1, %v4761_v6 }
 0xf08   :  { %v4526_v27 = vpop.f32.mrf.mxu1 }
 0xf09   :  { %v2034_v28 = vadd.f32 %v4526_v27, %v4175_v26 }
 0xf0a   :  { %v2028_v29 = vpop.f32.mrf.mxu1 }
 0xf0b   :  { %v2029_v30 = vadd.f32 %v4175_v26, %v2028_v29  ;;  %v2038_v31 = vadd.f32 %v2034_v28, %v1845_v15 }
 0xf0d   :  { %v2044_v11 = vsel %vm62_vm0, %v2038_v31, 0.0  ;;  %v2037_v32 = vadd.f32 %v2029_v30, %v1844_v14 }
 0xf0e   :  { %2045 = vadd.xlane.f32.xlu0 %v2044_v11 }
 0xf0f   :  { %v2041_v33 = vsel %vm62_vm0, %v2037_v32, 0.0 }
 0xf10   :  { %2042 = vadd.xlane.f32.xlu1 %v2041_v33 }
 0xf97   :  { %v2046_v34 = vpop.xlane.xlu0 %2045 }
 0xf98   :  { %v2048_v35 = vmul.f32 0.03125, %v2046_v34 }
 0xf99   :  { %v2043_v36 = vpop.xlane.xlu1 %2042 }
 0xf9a   :  { %v2050_v37 = vsub.f32 %v2038_v31, %v2048_v35  ;;  %v2047_v38 = vmul.f32 0.03125, %v2043_v36 }
 0xf9c   :  { %v2049_v39 = vsub.f32 %v2037_v32, %v2047_v38  ;;  %v2052_v40 = vmul.f32 %v2050_v37, %v2050_v37 }
 0xf9e   :  { %v2056_v41 = vsel %vm62_vm0, %v2052_v40, 0.0  ;;  %v2051_v42 = vmul.f32 %v2049_v39, %v2049_v39 }
 0xf9f   :  { %2057 = vadd.xlane.f32.xlu0 %v2056_v41 }
 0xfa0   :  { %v2053_v43 = vsel %vm62_vm0, %v2051_v42, 0.0 }
 0xfa1   :  { %2054 = vadd.xlane.f32.xlu1 %v2053_v43 }
0x1028   :  { %v2058_v48 = vpop.xlane.xlu0 %2057 }
0x1029   :  { %v2060_v49 = vmul.f32 0.03125, %v2058_v48 }
0x102a   :  { %v2055_v50 = vpop.xlane.xlu1 %2054 }
0x102b   :  { %v2062_v51 = vadd.f32 1e-05, %v2060_v49  ;;  %v2059_v5 = vmul.f32 0.03125, %v2055_v50 }
0x102d   :  { %4717 = vrsqrt.f32 %v2062_v51  ;;  %v2061_v2 = vadd.f32 1e-05, %v2059_v5 }
0x102f   :  { %4719 = vrsqrt.f32 %v2061_v2 }
0x103a   :  { %v4718_v52 = vpop.eup %4717 }
0x103b   :  { %v2066_v54 = vmul.f32 %v4718_v52, %v2050_v37 }
0x103c   :  { %v4720_v55 = vpop.eup %4719 }
0x103d   :  { %v2065_v56 = vmul.f32 %v4720_v55, %v2049_v39  ;;  %v2074_v57 = vmul.f32 %v4178_v53, %v2066_v54 }
0x103f   :  { %v2073_v59 = vmul.f32 %v4178_v53, %v2065_v56  ;;  %v5132_v61 = vadd.f32 %v4179_v58, %v2074_v57  ;;  %v4185_v57 = vld [vmem:[%s5389_s3 + $0x20] sm:$0xff] }
0x1041   :  { %v5130_v60 = vadd.f32 %v4179_v58, %v2073_v59 }
0x1043   :  { %4535 = vmatprep.mubr.msk.f32.mxu0 %vm62_vm0, %v5130_v60 }
0x1044   :  { %4536 = vmatmul.mubr.msk.f32.vlgmr.msra.gmra.mxu0 %vm62_vm0, %v5132_v61 }
0x1045   :  { %4540 = vmatprep.mubr.msk.f32.mxu0 %vm4762_vm1, %v4761_v6 }
0x1104   :  { %v4537_v63 = vpop.f32.mrf.mxu0 }
0x1105   :  { %v5143_v0 = vadd.f32 %v4537_v63, %v4190_v62 }
0x1106   :  { %v2175_v1 = vpop.f32.mrf.mxu0 }
0x1107   :  { %v5145_v3 = vadd.f32 %v4190_v62, %v2175_v1  ;;  %2262 = vrot.lane.b32.xlu0 %v5143_v0, %s4763_s21 }
0x1109   :  { %2185 = vrot.lane.b32.xlu1 %v5145_v3, %s4763_s21 }
0x1179   :  { %v2263_v4 = vpop.permute.xlu0 %2262 }
0x117a   :  { %4544 = vmatpush3.xpose.msk.msra.mxu1 %vm147_vm2, %v2263_v4 }
0x117b   :  { %v2186_v7 = vpop.permute.xlu1 %2185  ;;  %4553 = vmatprep.subr.mxu1 %v4761_v6 }
0x117c   :  { %4539 = vmatpush3.xpose.msk.msra.mxu0 %vm147_vm2, %v2186_v7 }
0x117d   :  { %4546 = vmatmul.mubr.msk.f32.vlgmr.msra.gmra.mxu1 %vm147_vm2, %v5143_v0  ;;  %4548 = vmatprep.subr.mxu0 %v4761_v6 }
0x117e   :  { %4555 = vmatprep.mubr.msk.f32.mxu1 %vm4762_vm1, %v4761_v6 }
0x117f   :  { %4541 = vmatmul.mubr.msk.f32.vlgmr.msra.gmra.mxu0 %vm147_vm2, %v5145_v3 }
0x1180   :  { %4550 = vmatprep.mubr.msk.f32.mxu0 %vm4762_vm1, %v4761_v6 }
0x123d   :  { %v2334_v8 = vpop.f32.mrf.mxu1 }
0x123e   :  { %v2341_v9 = vsel %vm147_vm2, %v2334_v8, -inf }
0x123f   :  { %2342 = vmax.xlane.f32.xlu0 %v2341_v9  ;;  %v2257_v12 = vpop.f32.mrf.mxu0  ;;  %v4547_v13 = vpop.f32.mrf.mxu1  ;;  %v4186_v9 = vld [vmem:[%s5389_s3 + $0x28] sm:$0xff] }
0x1240   :  { %v2338_v14 = vsel %vm147_vm2, %v2257_v12, -inf }
0x1241   :  { %2339 = vmax.xlane.f32.xlu1 %v2338_v14  ;;  %v4542_v15 = vpop.f32.mrf.mxu0 }
0x1252   :  { %2360 = vrot.lane.b32.xlu1 %v5145_v3, %s4764_s22 }
0x1255   :  { %2436 = vrot.lane.b32.xlu0 %v5143_v0, %s4764_s22 }
0x1256   :  { %2514 = vrot.lane.b32.xlu1 %v5145_v3, %s4766_s24 }
0x125a   :  { %2592 = vrot.lane.b32.xlu1 %v5143_v0, %s4766_s24 }
0x12c8   :  { %v2343_v16 = vpop.xlane.xlu0 %2342 }
0x12c9   :  { %v2345_v17 = vsub.f32 %v2334_v8, %v2343_v16 }
0x12ca   :  { %v2340_v18 = vpop.xlane.xlu1 %2339 }
0x12cb   :  { %v2348_v19 = vmul.f32 1.442695, %v2345_v17  ;;  %v2344_v20 = vsub.f32 %v2257_v12, %v2340_v18 }
0x12cc   :  { %v2437_v22 = vpop.permute.xlu0 %2436 }
0x12cd   :  { %4721 = vpow2.f32 %v2348_v19  ;;  %v2346_v21 = vmul.f32 1.442695, %v2344_v20  ;;  %4554 = vmatpush3.msra.mxu1 %v2437_v22 }
0x12ce   :  { %v2361_v23 = vpop.permute.xlu1 %2360  ;;  %4563 = vmatprep.subr.mxu1 %v4761_v6 }
0x12cf   :  { %4723 = vpow2.f32 %v2346_v21  ;;  %4549 = vmatpush3.msra.mxu0 %v2361_v23 }
0x12d0   :  { %4558 = vmatprep.subr.mxu0 %v4761_v6 }
0x12d2   :  { %v2515_v27 = vpop.permute.xlu1 %2514 }
0x12d6   :  { %v2593_v28 = vpop.permute.xlu1 %2592 }
0x12da   :  { %v4722_v24 = vpop.eup %4721 }
0x12db   :  { %v2353_v10 = vsel %vm147_vm2, %v4722_v24, 0.0 }
0x12dc   :  { %v4724_v25 = vpop.eup %4723  ;;  %2354 = vadd.xlane.f32.xlu0 %v2353_v10 }
0x12dd   :  { %v2350_v26 = vsel %vm147_vm2, %v4724_v25, 0.0 }
0x12de   :  { %2351 = vadd.xlane.f32.xlu1 %v2350_v26 }
0x12ef   :  { %2590 = vrot.lane.b32.xlu1 %v5143_v0, %s4765_s23 }
0x12f2   :  { %2512 = vrot.lane.b32.xlu0 %v5145_v3, %s4765_s23 }
0x1365   :  { %v2355_v29 = vpop.xlane.xlu0 %2354 }
0x1366   :  { %4725 = vrcp.f32 %v2355_v29 }
0x1367   :  { %v2352_v30 = vpop.xlane.xlu1 %2351 }
0x1368   :  { %4727 = vrcp.f32 %v2352_v30 }
0x1369   :  { %v2513_v35 = vpop.permute.xlu0 %2512 }
0x136b   :  { %v2591_v34 = vpop.permute.xlu1 %2590 }
0x1373   :  { %v4726_v31 = vpop.eup %4725 }
0x1374   :  { %v2359_v11 = vmul.f32 %v4726_v31, %v4722_v24 }
0x1375   :  { %v4728_v32 = vpop.eup %4727 }
0x1376   :  { %4556 = vmatmul.mubr.msk.f32.vlgmr.msra.gmra.mxu1 %vm147_vm2, %v2359_v11  ;;  %v2358_v33 = vmul.f32 %v4728_v32, %v4724_v25 }
0x1377   :  { %4564 = vmatpush3.xpose.msk.msra.mxu1 %vm147_vm2, %v2593_v28  ;;  %4565 = vmatprep.mubr.msk.f32.mxu1 %vm4762_vm1, %v4761_v6 }
0x1378   :  { %4551 = vmatmul.mubr.msk.f32.vlgmr.msra.gmra.mxu0 %vm147_vm2, %v2358_v33  ;;  %4573 = vmatprep.subr.mxu1 %v4761_v6 }
0x1379   :  { %4559 = vmatpush3.xpose.msk.msra.mxu0 %vm147_vm2, %v2515_v27  ;;  %4560 = vmatprep.mubr.msk.f32.mxu0 %vm4762_vm1, %v4761_v6 }
0x137a   :  { %4566 = vmatmul.mubr.msk.f32.vlgmr.msra.gmra.mxu1 %vm147_vm2, %v2591_v34  ;;  %4568 = vmatprep.subr.mxu0 %v4761_v6 }
0x137b   :  { %4575 = vmatprep.mubr.msk.f32.mxu1 %vm4762_vm1, %v4761_v6 }
0x137c   :  { %4561 = vmatmul.mubr.msk.f32.vlgmr.msra.gmra.mxu0 %vm147_vm2, %v2513_v35 }
0x137d   :  { %4570 = vmatprep.mubr.msk.f32.mxu0 %vm4762_vm1, %v4761_v6 }
0x1436   :  { %v2508_v36 = vpop.f32.mrf.mxu1 }
0x1438   :  { %v2432_v37 = vpop.f32.mrf.mxu0  ;;  %v4557_v38 = vpop.f32.mrf.mxu1 }
0x143a   :  { %v4552_v39 = vpop.f32.mrf.mxu0  ;;  %v2664_v40 = vpop.f32.mrf.mxu1 }
0x143b   :  { %v2671_v41 = vsel %vm147_vm2, %v2664_v40, -inf }
0x143c   :  { %2672 = vmax.xlane.f32.xlu1 %v2671_v41  ;;  %v2586_v42 = vpop.f32.mrf.mxu0  ;;  %v4567_v43 = vpop.f32.mrf.mxu1 }
0x143d   :  { %v2668_v44 = vsel %vm147_vm2, %v2586_v42, -inf }
0x143e   :  { %2669 = vmax.xlane.f32.xlu0 %v2668_v44  ;;  %v4562_v45 = vpop.f32.mrf.mxu0 }
0x143f   :  { %v4187_v45 = vld [vmem:[%s5389_s3 + $0x30] sm:$0xff] }
0x144d   :  { %2690 = vrot.lane.b32.xlu1 %v5145_v3, %s4767_s25 }
0x1451   :  { %3006 = vrot.lane.b32.xlu1 %v5145_v3, %s4769_s27 }
0x1455   :  { %3084 = vrot.lane.b32.xlu1 %v5143_v0, %s4769_s27 }
0x1459   :  { %3082 = vrot.lane.b32.xlu1 %v5143_v0, %s4768_s26 }
0x14c5   :  { %v2673_v46 = vpop.xlane.xlu1 %2672 }
0x14c6   :  { %v2675_v47 = vsub.f32 %v2664_v40, %v2673_v46 }
0x14c7   :  { %v2670_v48 = vpop.xlane.xlu0 %2669 }
0x14c8   :  { %v2678_v49 = vmul.f32 1.442695, %v2675_v47  ;;  %v2674_v50 = vsub.f32 %v2586_v42, %v2670_v48 }
0x14c9   :  { %v2691_v51 = vpop.permute.xlu1 %2690 }
0x14ca   :  { %4729 = vpow2.f32 %v2678_v49  ;;  %v2676_v5 = vmul.f32 1.442695, %v2674_v50  ;;  %4569 = vmatpush3.msra.mxu0 %v2691_v51 }
0x14cb   :  { %4578 = vmatprep.subr.mxu0 %v4186_v9 }
0x14cc   :  { %4731 = vpow2.f32 %v2676_v5 }
0x14cd   :  { %v3007_v59 = vpop.permute.xlu1 %3006 }
0x14d1   :  { %v3085_v4 = vpop.permute.xlu1 %3084 }
0x14d5   :  { %v3083_v8 = vpop.permute.xlu1 %3082 }
0x14d7   :  { %v4730_v2 = vpop.eup %4729 }
0x14d8   :  { %v2683_v52 = vsel %vm147_vm2, %v4730_v2, 0.0 }
0x14d9   :  { %v4732_v53 = vpop.eup %4731  ;;  %2684 = vadd.xlane.f32.xlu0 %v2683_v52 }
0x14da   :  { %v2680_v54 = vsel %vm147_vm2, %v4732_v53, 0.0 }
0x14dd   :  { %2681 = vadd.xlane.f32.xlu0 %v2680_v54 }
0x14f3   :  { %2766 = vrot.lane.b32.xlu0 %v5143_v0, %s4767_s25 }
0x14f7   :  { %3004 = vrot.lane.b32.xlu0 %v5145_v3, %s4768_s26  ;;  %s5402_s26 = smov 40  }
0x1562   :  { %v2685_v55 = vpop.xlane.xlu0 %2684 }
0x1563   :  { %4733 = vrcp.f32 %v2685_v55 }
0x1566   :  { %v2682_v56 = vpop.xlane.xlu0 %2681 }
0x1567   :  { %4735 = vrcp.f32 %v2682_v56 }
0x156a   :  { %v2767_v58 = vpop.permute.xlu0 %2766 }
0x156b   :  { %4574 = vmatpush3.msra.mxu1 %v2767_v58 }
0x156c   :  { %4583 = vmatprep.subr.mxu1 %v4185_v57 }
0x156e   :  { %v3005_v19 = vpop.permute.xlu0 %3004 }
0x1570   :  { %v4734_v62 = vpop.eup %4733 }
0x1571   :  { %v2689_v63 = vmul.f32 %v4734_v62, %v4730_v2 }
0x1573   :  { %4576 = vmatmul.mubr.msk.f32.vlgmr.msra.gmra.mxu1 %vm147_vm2, %v2689_v63 }
0x1574   :  { %v4736_v1 = vpop.eup %4735  ;;  %4585 = vmatprep.mubr.msk.f32.mxu1 %vm147_vm2, %v2432_v37  ;;  %4584 = vmatpush3.msra.mxu1 %v4185_v57 }
0x1575   :  { %4593 = vmatprep.subr.mxu1 %v4761_v6  ;;  %v2688_v7 = vmul.f32 %v4736_v1, %v4732_v53 }
0x1577   :  { %4571 = vmatmul.mubr.msk.f32.vlgmr.msra.gmra.mxu0 %vm147_vm2, %v2688_v7  ;;  %4586 = vmatmul.mubr.msk.f32.vlgmr.msra.gmra.mxu1 %vm147_vm2, %v2508_v36 }
0x1578   :  { %4594 = vmatpush3.xpose.msk.msra.mxu1 %vm147_vm2, %v3085_v4  ;;  %4595 = vmatprep.mubr.msk.f32.mxu1 %vm4762_vm1, %v4761_v6 }
0x1579   :  { %4603 = vmatprep.subr.mxu1 %v4761_v6  ;;  %4579 = vmatpush3.msra.mxu0 %v4186_v9 }
0x157a   :  { %4588 = vmatprep.subr.mxu0 %v4761_v6 }
0x157b   :  { %4596 = vmatmul.mubr.msk.f32.vlgmr.msra.gmra.mxu1 %vm147_vm2, %v3083_v8 }
0x157c   :  { %4605 = vmatprep.mubr.msk.f32.mxu1 %vm4762_vm1, %v4761_v6 }
0x1633   :  { %v2838_v12 = vpop.f32.mrf.mxu1 }
0x1635   :  { %v4577_v13 = vpop.f32.mrf.mxu1 }
0x1637   :  { %v2762_v14 = vpop.f32.mrf.mxu0  ;;  %v5232_v15 = vpop.f32.mrf.mxu1 }
0x1638   :  { %4580 = vmatprep.mubr.msk.f32.mxu0 %vm147_vm2, %v2762_v14 }
0x1639   :  { %v4572_v16 = vpop.f32.mrf.mxu0  ;;  %4581 = vmatmul.mubr.msk.f32.vlgmr.msra.gmra.mxu0 %vm147_vm2, %v2838_v12  ;;  %v5236_v17 = vpop.f32.mrf.mxu1 }
0x163a   :  { %4589 = vmatpush3.xpose.msk.msra.mxu0 %vm147_vm2, %v3007_v59  ;;  %4590 = vmatprep.mubr.msk.f32.mxu0 %vm4762_vm1, %v4761_v6 }
0x163b   :  { %v3156_v18 = vpop.f32.mrf.mxu1  ;;  %4598 = vmatprep.subr.mxu0 %v4761_v6 }
0x163c   :  { %v3163_v20 = vsel %vm147_vm2, %v3156_v18, -inf }
0x163d   :  { %3164 = vmax.xlane.f32.xlu1 %v3163_v20  ;;  %4591 = vmatmul.mubr.msk.f32.vlgmr.msra.gmra.mxu0 %vm147_vm2, %v3005_v19  ;;  %v4597_v22 = vpop.f32.mrf.mxu1 }
0x163e   :  { %4600 = vmatprep.mubr.msk.f32.mxu0 %vm4762_vm1, %v4761_v6 }
0x164e   :  { %3182 = vrot.lane.b32.xlu1 %v5145_v3, %s4770_s15 }
0x1652   :  { %3419 = vrot.lane.b32.xlu1 %v5145_v3, %s4771_s16 }
0x1656   :  { %3497 = vrot.lane.b32.xlu1 %v5143_v0, %s4771_s16 }
0x165a   :  { %3495 = vrot.lane.b32.xlu1 %v5143_v0, %s4772_s17 }
0x16c6   :  { %v3165_v21 = vpop.xlane.xlu1 %3164 }
0x16c7   :  { %v3167_v24 = vsub.f32 %v3156_v18, %v3165_v21 }
0x16c9   :  { %v3170_v10 = vmul.f32 1.442695, %v3167_v24 }
0x16ca   :  { %v3183_v23 = vpop.permute.xlu1 %3182 }
0x16cb   :  { %4599 = vmatpush3.msra.mxu0 %v3183_v23  ;;  %4737 = vpow2.f32 %v3170_v10 }
0x16cc   :  { %4608 = vmatprep.subr.mxu0 %v4187_v45 }
0x16ce   :  { %v3420_v41 = vpop.permute.xlu1 %3419 }
0x16d2   :  { %v3498_v51 = vpop.permute.xlu1 %3497 }
0x16d6   :  { %v3496_v52 = vpop.permute.xlu1 %3495 }
0x16d8   :  { %v4738_v29 = vpop.eup %4737 }
0x16d9   :  { %v3175_v31 = vsel %vm147_vm2, %v4738_v29, 0.0 }
0x16f9   :  { %v5254_v25 = vpop.f32.mrf.mxu0 }
0x16fa   :  { %v3001_v58 = vadd.f32 %v5232_v15, %v5254_v25 }
0x16fb   :  { %v5256_v26 = vpop.f32.mrf.mxu0 }
0x16fc   :  { %v2996_v62 = vadd.f32 %v5236_v17, %v5256_v26  ;;  %v4225_v26 = vld [vmem:[%s5390_s4 + $0x1] ss:$0 sm:$0xff] }
0x16fd   :  { %v3078_v27 = vpop.f32.mrf.mxu0 }
0x16fe   :  { %v3160_v28 = vsel %vm147_vm2, %v3078_v27, -inf }
0x16ff   :  { %3161 = vmax.xlane.f32.xlu0 %v3160_v28  ;;  %v4592_v30 = vpop.f32.mrf.mxu0 }
0x1703   :  { %3176 = vadd.xlane.f32.xlu0 %v3175_v31 }
0x1788   :  { %v3162_v11 = vpop.xlane.xlu0 %3161 }
0x1789   :  { %v3166_v32 = vsub.f32 %v3078_v27, %v3162_v11 }
0x178b   :  { %v3168_v33 = vmul.f32 1.442695, %v3166_v32 }
0x178c   :  { %v3177_v36 = vpop.xlane.xlu0 %3176 }
0x178d   :  { %4739 = vpow2.f32 %v3168_v33 }
0x178e   :  { %4741 = vrcp.f32 %v3177_v36 }
0x179a   :  { %v4740_v34 = vpop.eup %4739 }
0x179b   :  { %v3172_v35 = vsel %vm147_vm2, %v4740_v34, 0.0  ;;  %v4742_v38 = vpop.eup %4741 }
0x179c   :  { %3173 = vadd.xlane.f32.xlu0 %v3172_v35  ;;  %v3181_v40 = vmul.f32 %v4742_v38, %v4738_v29 }
0x17b2   :  { %3258 = vrot.lane.b32.xlu0 %v5143_v0, %s4770_s15 }
0x17b6   :  { %3417 = vrot.lane.b32.xlu0 %v5145_v3, %s4772_s17 }
0x1825   :  { %v3174_v37 = vpop.xlane.xlu0 %3173 }
0x1826   :  { %4743 = vrcp.f32 %v3174_v37 }
0x1829   :  { %v3259_v39 = vpop.permute.xlu0 %3258 }
0x182a   :  { %4604 = vmatpush3.msra.mxu1 %v3259_v39 }
0x182b   :  { %4606 = vmatmul.mubr.msk.f32.vlgmr.msra.gmra.mxu1 %vm147_vm2, %v3181_v40  ;;  %4613 = vmatprep.subr.mxu1 %v4761_v6 }
0x182c   :  { %4614 = vmatpush3.xpose.msk.msra.mxu1 %vm147_vm2, %v3420_v41  ;;  %4615 = vmatprep.mubr.msk.f32.mxu1 %vm4762_vm1, %v4761_v6 }
0x182d   :  { %v3418_v42 = vpop.permute.xlu0 %3417  ;;  %4623 = vmatprep.subr.mxu1 %v4761_v6 }
0x182f   :  { %4616 = vmatmul.mubr.msk.f32.vlgmr.msra.gmra.mxu1 %vm147_vm2, %v3418_v42 }
0x1830   :  { %4625 = vmatprep.mubr.msk.f32.mxu1 %vm4762_vm1, %v4761_v6 }
0x1833   :  { %v4744_v43 = vpop.eup %4743 }
0x1834   :  { %v3180_v44 = vmul.f32 %v4744_v43, %v4740_v34 }
0x1836   :  { %4601 = vmatmul.mubr.msk.f32.vlgmr.msra.gmra.mxu0 %vm147_vm2, %v3180_v44 }
0x1837   :  { %4609 = vmatpush3.msra.mxu0 %v4187_v45  ;;  %v4232_v45 = vld [vmem:[%s5391_s5 + $0x30] sm:$0xff] }
0x1838   :  { %4618 = vmatprep.subr.mxu0 %v4761_v6 }
0x18eb   :  { %v3330_v46 = vpop.f32.mrf.mxu1 }
0x18ed   :  { %v4607_v47 = vpop.f32.mrf.mxu1 }
0x18ee   :  { %v4230_v47 = vld [vmem:[%s5391_s5 + $0x20] sm:$0xff] }
0x18ef   :  { %v3491_v48 = vpop.f32.mrf.mxu1 }
0x18f0   :  { %v3573_v49 = vsel %vm147_vm2, %v3491_v48, -inf }
0x18f1   :  { %3574 = vmax.xlane.f32.xlu0 %v3573_v49  ;;  %v4617_v50 = vpop.f32.mrf.mxu1  ;;  %v4244_v49 = vld [vmem:[%s5392_s7 + $0x70] sm:$0xff] }
0x18f2   :  { %v4243_v50 = vld [vmem:[%s5392_s7 + $0x68] sm:$0xff] }
0x18f6   :  { %v3254_v5 = vpop.f32.mrf.mxu0 }
0x18f7   :  { %4610 = vmatprep.mubr.msk.f32.mxu0 %vm147_vm2, %v3254_v5 }
0x18f8   :  { %v4602_v2 = vpop.f32.mrf.mxu0  ;;  %4611 = vmatmul.mubr.msk.f32.vlgmr.msra.gmra.mxu0 %vm147_vm2, %v3330_v46  ;;  %v4231_v46 = vld [vmem:[%s5391_s5 + $0x28] sm:$0xff] }
0x18f9   :  { %4619 = vmatpush3.xpose.msk.msra.mxu0 %vm147_vm2, %v3498_v51  ;;  %4620 = vmatprep.mubr.msk.f32.mxu0 %vm4762_vm1, %v4761_v6  ;;  %v4242_v51 = vld [vmem:[%s5392_s7 + $0x60] sm:$0xff] }
0x18fa   :  { %4628 = vmatprep.subr.mxu0 %v4761_v6 }
0x18fc   :  { %4621 = vmatmul.mubr.msk.f32.vlgmr.msra.gmra.mxu0 %vm147_vm2, %v3496_v52 }
0x18fd   :  { %4630 = vmatprep.mubr.msk.f32.mxu0 %vm4762_vm1, %v4761_v6 }
0x197a   :  { %v3575_v53 = vpop.xlane.xlu0 %3574 }
0x197b   :  { %v3579_v54 = vsub.f32 %v3491_v48, %v3575_v53  ;;  %v4245_v48 = vld [vmem:[%s5392_s7 + $0x78] sm:$0xff] }
0x197d   :  { %v3581_v55 = vmul.f32 1.442695, %v3579_v54 }
0x197f   :  { %4745 = vpow2.f32 %v3581_v55 }
0x198c   :  { %v4746_v56 = vpop.eup %4745 }
0x198d   :  { %v3585_v57 = vsel %vm147_vm2, %v4746_v56, 0.0 }
0x198e   :  { %3586 = vadd.xlane.f32.xlu0 %v3585_v57  ;;  %v4228_v57 = vld [vmem:[%s5393_s9 + $0x1] ss:$0 sm:$0xff] }
0x19b8   :  { %v4612_v59 = vpop.f32.mrf.mxu0 }
0x19b9   :  { %v3416_v63 = vadd.f32 %v4612_v59, %v3001_v58 }
0x19ba   :  { %v3406_v1 = vpop.f32.mrf.mxu0 }
0x19bb   :  { %v3415_v4 = vadd.f32 %v3406_v1, %v2996_v62  ;;  %v4229_v1 = vld [vmem:[%s5394_s10 + $0x1] ss:$0 sm:$0xff] }
0x19bc   :  { %v3569_v7 = vpop.f32.mrf.mxu0 }
0x19bd   :  { %v3576_v6 = vsel %vm147_vm2, %v3569_v7, -inf }
0x19be   :  { %3577 = vmax.xlane.f32.xlu1 %v3576_v6  ;;  %v4622_v8 = vpop.f32.mrf.mxu0 }
0x19bf   :  { %v4241_v8 = vld [vmem:[%s5392_s7 + $0x58] sm:$0xff] }
0x19cf   :  { %3595 = vrot.lane.b32.xlu1 %v5145_v3, %s5402_s26  ;;  %v4188_v3 = vld [vmem:[%s5389_s3 + $0x38] sm:$0xff] }
0x1a17   :  { %v3587_v9 = vpop.xlane.xlu0 %3586 }
0x1a18   :  { %4747 = vrcp.f32 %v3587_v9  ;;  %v4240_v9 = vld [vmem:[%s5392_s7 + $0x50] sm:$0xff] }
0x1a25   :  { %v4748_v13 = vpop.eup %4747 }
0x1a26   :  { %v3593_v18 = vmul.f32 %v4748_v13, %v4746_v56  ;;  %v4238_v13 = vld [vmem:[%s5392_s7 + $0x40] sm:$0xff] }
0x1a47   :  { %v3578_v12 = vpop.xlane.xlu1 %3577 }
0x1a48   :  { %v3580_v14 = vsub.f32 %v3569_v7, %v3578_v12  ;;  %v4239_v12 = vld [vmem:[%s5392_s7 + $0x48] sm:$0xff] }
0x1a4a   :  { %v3583_v15 = vmul.f32 1.442695, %v3580_v14  ;;  %v4235_v14 = vld [vmem:[%s5395_s6 + $0x1] ss:$0 sm:$0xff] }
0x1a4b   :  { %v3596_v16 = vpop.permute.xlu1 %3595 }
0x1a4c   :  { %4749 = vpow2.f32 %v3583_v15  ;;  %4624 = vmatpush3.msra.mxu1 %v3596_v16 }
0x1a4d   :  { %4626 = vmatmul.mubr.msk.f32.vlgmr.msra.gmra.mxu1 %vm147_vm2, %v3593_v18  ;;  %4633 = vmatprep.subr.mxu1 %v4188_v3 }
0x1a4e   :  { %4634 = vmatpush3.msra.mxu1 %v4188_v3 }
0x1a4f   :  { %4649 = vmatprep.subr.mxu1 %v4245_v48 }
0x1a59   :  { %v4750_v17 = vpop.eup %4749 }
0x1a5a   :  { %v3588_v19 = vsel %vm147_vm2, %v4750_v17, 0.0 }
0x1a5b   :  { %3589 = vadd.xlane.f32.xlu0 %v3588_v19 }
0x1a71   :  { %3671 = vrot.lane.b32.xlu0 %v5143_v0, %s5402_s26 }
0x1ae4   :  { %v3590_v20 = vpop.xlane.xlu0 %3589 }
0x1ae5   :  { %4751 = vrcp.f32 %v3590_v20  ;;  %v4247_v20 = vld [vmem:[%s5396_s8 + $0x1] ss:$0 sm:$0xff] }
0x1ae8   :  { %v3672_v22 = vpop.permute.xlu0 %3671 }
0x1ae9   :  { %4629 = vmatpush3.msra.mxu0 %v3672_v22 }
0x1af2   :  { %v4752_v21 = vpop.eup %4751 }
0x1af3   :  { %v3594_v23 = vmul.f32 %v4752_v21, %v4750_v17 }
0x1af5   :  { %4631 = vmatmul.mubr.msk.f32.vlgmr.msra.gmra.mxu0 %vm147_vm2, %v3594_v23 }
0x1b0d   :  { %v3667_v24 = vpop.f32.mrf.mxu1 }
0x1b0e   :  { %4635 = vmatprep.mubr.msk.f32.mxu1 %vm147_vm2, %v3667_v24 }
0x1b0f   :  { %v4627_v10 = vpop.f32.mrf.mxu1 }
0x1bb5   :  { %v3743_v25 = vpop.f32.mrf.mxu0 }
0x1bb6   :  { %4636 = vmatmul.mubr.msk.f32.vlgmr.msra.gmra.mxu1 %vm147_vm2, %v3743_v25 }
0x1bb7   :  { %v4632_v0 = vpop.f32.mrf.mxu0  ;;  %4650 = vmatpush3.msra.mxu1 %v4245_v48 }
0x1bb8   :  { %4651 = vmatprep.subr.mxu1 %v4244_v49 }
0x1bb9   :  { %4652 = vmatpush3.msra.mxu1 %v4244_v49 }
0x1bba   :  { %4653 = vmatprep.subr.mxu1 %v4243_v50 }
0x1bbb   :  { %4654 = vmatpush3.msra.mxu1 %v4243_v50 }
0x1bbc   :  { %4655 = vmatprep.subr.mxu1 %v4242_v51 }
0x1bbd   :  { %4656 = vmatpush3.msra.mxu1 %v4242_v51 }
0x1bbe   :  { %4657 = vmatprep.subr.mxu1 %v4241_v8 }
0x1bbf   :  { %4658 = vmatpush3.msra.mxu1 %v4241_v8 }
0x1bc0   :  { %4659 = vmatprep.subr.mxu1 %v4240_v9 }
0x1bc1   :  { %4660 = vmatpush3.msra.mxu1 %v4240_v9 }
0x1bc2   :  { %4661 = vmatprep.subr.mxu1 %v4239_v12 }
0x1bc3   :  { %4662 = vmatpush3.msra.mxu1 %v4239_v12 }
0x1bc4   :  { %4663 = vmatprep.subr.mxu1 %v4238_v13 }
0x1bc5   :  { %4664 = vmatpush3.msra.mxu1 %v4238_v13 }
0x1c76   :  { %v4637_v27 = vpop.f32.mrf.mxu1 }
0x1c77   :  { %v3829_v28 = vadd.f32 %v4637_v27, %v3416_v63 }
0x1c78   :  { %v3819_v29 = vpop.f32.mrf.mxu1 }
0x1c79   :  { %v3837_v30 = vadd.f32 %v4225_v26, %v3829_v28  ;;  %v3828_v31 = vadd.f32 %v3819_v29, %v3415_v4 }
0x1c7b   :  { %v3836_v11 = vadd.f32 %v4225_v26, %v3828_v31  ;;  %v3839_v32 = vadd.f32 %v3837_v30, %v5132_v61 }
0x1c7d   :  { %v3847_v33 = vsel %vm62_vm0, %v3839_v32, 0.0  ;;  %v3838_v34 = vadd.f32 %v3836_v11, %v5130_v60  ;;  %v4233_v60 = vld [vmem:[%s5391_s5 + $0x38] sm:$0xff] }
0x1c7e   :  { %3848 = vadd.xlane.f32.xlu0 %v3847_v33  ;;  %4638 = vmatprep.subr.mxu0 %v4233_v60 }
0x1c7f   :  { %v3844_v35 = vsel %vm62_vm0, %v3838_v34, 0.0  ;;  %4639 = vmatpush3.msra.mxu0 %v4233_v60  ;;  %v4253_v60 = vld [vmem:[%s5398_s12 + $0x1] ss:$0 sm:$0xff] }
0x1c80   :  { %3845 = vadd.xlane.f32.xlu1 %v3844_v35  ;;  %4640 = vmatprep.subr.mxu0 %v4232_v45 }
0x1c81   :  { %4641 = vmatpush3.msra.mxu0 %v4232_v45 }
0x1c82   :  { %4642 = vmatprep.subr.mxu0 %v4231_v46 }
0x1c83   :  { %4643 = vmatpush3.msra.mxu0 %v4231_v46 }
0x1c84   :  { %4644 = vmatprep.subr.mxu0 %v4230_v47 }
0x1c85   :  { %4645 = vmatpush3.msra.mxu0 %v4230_v47 }
0x1d07   :  { %v3849_v36 = vpop.xlane.xlu0 %3848 }
0x1d08   :  { %v3851_v37 = vmul.f32 0.03125, %v3849_v36 }
0x1d09   :  { %v3846_v38 = vpop.xlane.xlu1 %3845 }
0x1d0a   :  { %v3853_v39 = vsub.f32 %v3839_v32, %v3851_v37  ;;  %v3850_v40 = vmul.f32 0.03125, %v3846_v38 }
0x1d0c   :  { %v3852_v41 = vsub.f32 %v3838_v34, %v3850_v40  ;;  %v3855_v42 = vmul.f32 %v3853_v39, %v3853_v39 }
0x1d0e   :  { %v3859_v43 = vsel %vm62_vm0, %v3855_v42, 0.0  ;;  %v3854_v44 = vmul.f32 %v3852_v41, %v3852_v41 }
0x1d0f   :  { %3860 = vadd.xlane.f32.xlu0 %v3859_v43  ;;  %v4252_v43 = vld [vmem:[%s5397_s11 + $0x1] ss:$0 sm:$0xff] }
0x1d10   :  { %v3856_v61 = vsel %vm62_vm0, %v3854_v44, 0.0 }
0x1d11   :  { %3857 = vadd.xlane.f32.xlu1 %v3856_v61 }
0x1d98   :  { %v3861_v5 = vpop.xlane.xlu0 %3860 }
0x1d99   :  { %v3863_v2 = vmul.f32 0.03125, %v3861_v5 }
0x1d9a   :  { %v3858_v52 = vpop.xlane.xlu1 %3857 }
0x1d9b   :  { %v3865_v53 = vadd.f32 1e-05, %v3863_v2  ;;  %v3862_v54 = vmul.f32 0.03125, %v3858_v52 }
0x1d9d   :  { %4753 = vrsqrt.f32 %v3865_v53  ;;  %v3864_v55 = vadd.f32 1e-05, %v3862_v54 }
0x1d9f   :  { %4755 = vrsqrt.f32 %v3864_v55 }
0x1daa   :  { %v4754_v56 = vpop.eup %4753 }
0x1dab   :  { %v3869_v58 = vmul.f32 %v4754_v56, %v3853_v39 }
0x1dac   :  { %v4756_v59 = vpop.eup %4755 }
0x1dad   :  { %v3868_v62 = vmul.f32 %v4756_v59, %v3852_v41  ;;  %v3877_v63 = vmul.f32 %v4228_v57, %v3869_v58 }
0x1daf   :  { %v3876_v4 = vmul.f32 %v4228_v57, %v3868_v62  ;;  %v3885_v6 = vadd.f32 %v4229_v1, %v3877_v63 }
0x1db1   :  { %v3884_v7 = vadd.f32 %v4229_v1, %v3876_v4 }
0x1db3   :  { %4646 = vmatprep.mubr.msk.f32.mxu0 %vm62_vm0, %v3884_v7 }
0x1db4   :  { %4647 = vmatmul.mubr.msk.f32.vlgmr.msra.gmra.mxu0 %vm62_vm0, %v3885_v6 }
0x1e74   :  { %v4648_v15 = vpop.f32.mrf.mxu0 }
0x1e75   :  { %v3977_v16 = vadd.f32 %v4648_v15, %v4235_v14 }
0x1e76   :  { %v3971_v18 = vpop.f32.mrf.mxu0 }
0x1e77   :  { %v3972_v17 = vadd.f32 %v4235_v14, %v3971_v18  ;;  %v3981_v3 = vmax.f32 %v3977_v16, 0.0 }
0x1e79   :  { %v3980_v19 = vmax.f32 %v3972_v17, 0.0 }
0x1e7b   :  { %4665 = vmatprep.mubr.msk.f32.mxu1 %vm1955_vm3, %v3980_v19 }
0x1e7c   :  { %4666 = vmatmul.mubr.msk.f32.vlgmr.msra.gmra.mxu1 %vm1955_vm3, %v3981_v3 }
0x1f3c   :  { %v4667_v22 = vpop.f32.mrf.mxu1 }
0x1f3d   :  { %v4077_v21 = vadd.f32 %v4667_v22, %v4247_v20 }
0x1f3e   :  { %v4071_v23 = vpop.f32.mrf.mxu1 }
0x1f3f   :  { %v4072_v24 = vadd.f32 %v4247_v20, %v4071_v23  ;;  %v4081_v10 = vadd.f32 %v4077_v21, %v3885_v6 }
0x1f41   :  { %v4089_v25 = vsel %vm62_vm0, %v4081_v10, 0.0  ;;  %v4080_v0 = vadd.f32 %v4072_v24, %v3884_v7 }
0x1f42   :  { %4090 = vadd.xlane.f32.xlu0 %v4089_v25 }
0x1f43   :  { %v4086_v26 = vsel %vm62_vm0, %v4080_v0, 0.0 }
0x1f44   :  { %4087 = vadd.xlane.f32.xlu1 %v4086_v26 }
0x1fcb   :  { %v4091_v27 = vpop.xlane.xlu0 %4090 }
0x1fcc   :  { %v4093_v28 = vmul.f32 0.03125, %v4091_v27 }
0x1fcd   :  { %v4088_v29 = vpop.xlane.xlu1 %4087 }
0x1fce   :  { %v4095_v30 = vsub.f32 %v4081_v10, %v4093_v28  ;;  %v4092_v31 = vmul.f32 0.03125, %v4088_v29 }
0x1fd0   :  { %v4094_v11 = vsub.f32 %v4080_v0, %v4092_v31  ;;  %v4097_v32 = vmul.f32 %v4095_v30, %v4095_v30 }
0x1fd2   :  { %v4101_v33 = vsel %vm62_vm0, %v4097_v32, 0.0  ;;  %v4096_v34 = vmul.f32 %v4094_v11, %v4094_v11 }
0x1fd3   :  { %4102 = vadd.xlane.f32.xlu0 %v4101_v33 }
0x1fd4   :  { %v4098_v35 = vsel %vm62_vm0, %v4096_v34, 0.0 }
0x1fd5   :  { %4099 = vadd.xlane.f32.xlu1 %v4098_v35 }
0x205c   :  { %v4103_v36 = vpop.xlane.xlu0 %4102 }
0x205d   :  { %v4105_v37 = vmul.f32 0.03125, %v4103_v36 }
0x205e   :  { %v4100_v38 = vpop.xlane.xlu1 %4099 }
0x205f   :  { %v4107_v39 = vadd.f32 1e-05, %v4105_v37  ;;  %v4104_v40 = vmul.f32 0.03125, %v4100_v38 }
0x2061   :  { %4757 = vrsqrt.f32 %v4107_v39  ;;  %v4106_v41 = vadd.f32 1e-05, %v4104_v40 }
0x2063   :  { %4759 = vrsqrt.f32 %v4106_v41 }
0x206e   :  { %v4758_v42 = vpop.eup %4757 }
0x206f   :  { %v4111_v44 = vmul.f32 %v4758_v42, %v4095_v30 }
0x2070   :  { %v4760_v61 = vpop.eup %4759 }
0x2071   :  { %v4119_v45 = vmul.f32 %v4252_v43, %v4111_v44  ;;  %v4110_v46 = vmul.f32 %v4760_v61, %v4094_v11 }
0x2073   :  { %v4127_v47 = vadd.f32 %v4253_v60, %v4119_v45  ;;  %v4118_v48 = vmul.f32 %v4252_v43, %v4110_v46 }
0x2075   :  { %4129 = vst.msk [vmem:[%s5399_s13 + $0x8] sm:$0xff] %vm62_vm0, %v4127_v47  ;;  %v4126_v49 = vadd.f32 %v4253_v60, %v4118_v48 }
0x2077   :  { %4128 = vst.msk [vmem:[%s5399_s13] sm:$0xff] %vm62_vm0, %v4126_v49 }

</bundles_post_ra>
